<compile_context>
chip_gen: v7x
topology: tpu7x:2x2x1
jax: 0.10.0
libtpu: 0.0.40
codegen_flags: <defaults>
</compile_context>

<pallas_src>
import functools

import jax
import jax.numpy as jnp
import numpy as np
from jax import lax
from jax.experimental import pallas as pl
from jax.experimental.pallas import tpu as pltpu


# ----------------------------------------------------------------------------
# Wrapper-side constant-matrix builders (plain JAX, traced once under jit).
# ----------------------------------------------------------------------------

def _banded_conv_matrix(w_oihw, W):
    """(Cout, Cin, 3, 3) conv weights -> (3, W*Cin, W*Cout) banded matrices.

    For a lane-dense row x_flat[w*Cin + ci], (x_flat @ M[dy])[wo*Cout + co]
    equals the dy-row contribution of a 3x3 conv with padding=1 along W:
        sum_{dx, ci} w[co, ci, dy, dx] * xpad[wo + dx, ci]
    """
    Cout, Cin, _, _ = w_oihw.shape
    f32 = jnp.float32
    w_k = jnp.transpose(w_oihw, (2, 3, 1, 0)).astype(f32)      # (3, 3, Cin, Cout)
    wi = jnp.arange(W)[:, None]
    wo = jnp.arange(W)[None, :]
    dx = wi - wo + 1                                            # (W, W)
    valid = (dx >= 0) & (dx <= 2)
    dxc = jnp.clip(dx, 0, 2)
    g = w_k[:, dxc]                                             # (3, W, W, Cin, Cout)
    g = jnp.where(valid[None, :, :, None, None], g, 0.0)
    # -> (3, W_in, Cin, W_out, Cout) -> (3, W*Cin, W*Cout)
    return jnp.transpose(g, (0, 1, 3, 2, 4)).reshape(3, W * Cin, W * Cout)


def _upsample_matrix(n_in, n_out):
    """(n_out, n_in) bilinear align_corners=True interpolation matrix (up = M @ x)."""
    f32 = jnp.float32
    if n_in == 1:
        return jnp.ones((n_out, n_in), f32)
    s = jnp.arange(n_out, dtype=f32) * (n_in - 1) / (n_out - 1)
    i0 = jnp.clip(jnp.floor(s).astype(jnp.int32), 0, n_in - 1)
    i1 = jnp.clip(i0 + 1, 0, n_in - 1)
    f = s - i0.astype(f32)
    m = jnp.zeros((n_out, n_in), f32)
    r = jnp.arange(n_out)
    m = m.at[r, i0].add(1.0 - f)
    m = m.at[r, i1].add(f)
    return m


def _pick_block_batch(B, H, max_m=256, min_m=128):
    """Largest divisor Bt of B with Bt*H <= max_m; once M >= min_m is reached,
    only grow Bt further if at least 2 grid steps remain (megacore)."""
    best = 1
    for d in range(1, B + 1):
        if B % d:
            continue
        if d * H > max_m:
            break
        if best * H < min_m or B // d >= 2:
            best = d
    return best


# ----------------------------------------------------------------------------
# Fused Pallas kernel: Bt batch samples per grid step, everything in VMEM.
# ----------------------------------------------------------------------------

def _upconv_fused_kernel(x1_ref, x2_ref, uh_ref, uw_ref, m1_ref, m2_ref,
                         pool_ref, o_ref, *, eps, slope, bt, h, hw):
    f32 = jnp.float32
    bf16 = jnp.bfloat16
    n_rows = bt * h                       # stacked MXU M dimension
    h2 = h // 2

    # Sample-boundary masks for the +/-1 row shift of the 3x3 conv.
    row = lax.broadcasted_iota(jnp.int32, (n_rows, 1), 0)
    not_first = (row % h) != 0            # row h-1 doesn't exist for first row
    not_last = (row % h) != (h - 1)       # row h+1 doesn't exist for last row

    pool = pool_ref[...]                  # (W*Cout, W*Cout) f32 channel pooling
    inv_hw = 1.0 / hw

    def conv_in_lrelu(xin, m_ref):
        # xin: (n_rows, K) bf16; m_ref: (3, K, N) bf16.  Accumulate per-dy
        # contributions into one slab (keeps <=2 live (M,N) f32 temporaries).
        n = m_ref.shape[-1]
        acc = jnp.dot(xin, m_ref[1], preferred_element_type=f32)        # dy=1
        t = jnp.dot(xin, m_ref[0], preferred_element_type=f32)          # dy=0
        acc = acc + jnp.where(not_first, pltpu.roll(t, 1, axis=0), 0.0)
        t = jnp.dot(xin, m_ref[2], preferred_element_type=f32)          # dy=2
        acc = acc + jnp.where(not_last, pltpu.roll(t, n_rows - 1, axis=0), 0.0)

        # InstanceNorm (per sample, per channel) + LeakyReLU, f32.
        y3 = acc.reshape(bt, h, n)
        s1 = jnp.sum(y3, axis=1)                         # (bt, n): sum over H
        s2 = jnp.sum(y3 * y3, axis=1)
        mean = jnp.dot(s1, pool, preferred_element_type=f32) * inv_hw   # (bt, n)
        msq = jnp.dot(s2, pool, preferred_element_type=f32) * inv_hw
        var = jnp.maximum(msq - mean * mean, 0.0)
        scale = lax.rsqrt(var + eps)
        yn = (y3 - mean[:, None, :]) * scale[:, None, :]
        yn = jnp.where(yn >= 0, yn, slope * yn)
        return yn.reshape(n_rows, n)

    # Bilinear x2 upsample (align_corners=True) as two matmuls in the
    # batch-stacked layout: rows via block-diagonal UH, columns via UW.
    x2 = x2_ref[...].reshape(bt * h2, -1).astype(bf16)               # (bt*H2, W2*C2)
    x2h = jnp.dot(uh_ref[...], x2, preferred_element_type=f32)       # (n_rows, W2*C2)
    x2u = jnp.dot(x2h.astype(bf16), uw_ref[...],
                  preferred_element_type=f32)                        # (n_rows, W*C2)

    # conv1 on concat([x1, up(x2)], channel): lane-concat once, single K=128
    # matmul per dy against the row-stacked banded weights.
    x1 = x1_ref[...].reshape(n_rows, -1).astype(bf16)                # (n_rows, W*C1)
    xcat = jnp.concatenate([x1, x2u.astype(bf16)], axis=-1)          # (n_rows, W*Cin)

    y = conv_in_lrelu(xcat, m1_ref)                                  # (n_rows, W*Cout)
    y = conv_in_lrelu(y.astype(bf16), m2_ref)                        # conv2, in VMEM

    o_ref[...] = y.reshape(bt, h, -1).astype(o_ref.dtype)            # lane-dense store


# ----------------------------------------------------------------------------
# Public forward (PyTorch-compatible NCHW in / NCHW out).
# ----------------------------------------------------------------------------

def up_conv_forward(inputs1_nchw, inputs2_nchw, w1_oihw, b1, w2_oihw, b2,
                    *, eps=1e-5, slope=0.2):
    """UpConv.forward.  b1/b2 accepted for API parity but unused: they are
    cancelled exactly by InstanceNorm2d(affine=False)'s mean subtraction."""
    del b1, b2
    B, C1, H, W = inputs1_nchw.shape
    _, C2, H2, W2 = inputs2_nchw.shape
    assert H == 2 * H2 and W == 2 * W2
    Cout, Cin, _, _ = w1_oihw.shape
    assert Cin == C1 + C2
    f32, bf16 = jnp.float32, jnp.bfloat16

    Bt = _pick_block_batch(B, H)

    # NCHW -> lane-dense (B, H, W*C).
    x1 = jnp.transpose(inputs1_nchw, (0, 2, 3, 1)).reshape(B, H, W * C1)
    x2 = jnp.transpose(inputs2_nchw, (0, 2, 3, 1)).reshape(B, H2, W2 * C2)

    # Precomputed constant matrices (weight-sized, tiny).  bf16 on the MXU
    # path; the tiny pooling matrix stays f32 for the stats.
    m1 = jnp.concatenate([_banded_conv_matrix(w1_oihw[:, :C1], W),
                          _banded_conv_matrix(w1_oihw[:, C1:], W)],
                         axis=1).astype(bf16)                   # (3, W*Cin, W*Cout)
    m2 = _banded_conv_matrix(w2_oihw, W).astype(bf16)           # (3, W*Cout, W*Cout)
    uh = jnp.kron(jnp.eye(Bt, dtype=f32),
                  _upsample_matrix(H2, H)).astype(bf16)         # (Bt*H, Bt*H2)
    uw = jnp.kron(_upsample_matrix(W2, W).T,
                  jnp.eye(C2, dtype=f32)).astype(bf16)          # (W2*C2, W*C2)
    pool = jnp.kron(jnp.ones((W, W), f32), jnp.eye(Cout, dtype=f32))  # (W*Cout, W*Cout)

    kern = functools.partial(_upconv_fused_kernel, eps=eps, slope=slope,
                             bt=Bt, h=H, hw=H * W)

    out_flat = pl.pallas_call(
        kern,
        out_shape=jax.ShapeDtypeStruct((B, H, W * Cout), inputs1_nchw.dtype),
        grid_spec=pltpu.PrefetchScalarGridSpec(
            num_scalar_prefetch=0,
            grid=(B // Bt,),
            in_specs=[
                pl.BlockSpec((Bt, H, W * C1), lambda b: (b, 0, 0)),
                pl.BlockSpec((Bt, H2, W2 * C2), lambda b: (b, 0, 0)),
                pl.BlockSpec((Bt * H, Bt * H2), lambda b: (0, 0)),
                pl.BlockSpec((W2 * C2, W * C2), lambda b: (0, 0)),
                pl.BlockSpec((3, W * Cin, W * Cout), lambda b: (0, 0, 0)),
                pl.BlockSpec((3, W * Cout, W * Cout), lambda b: (0, 0, 0)),
                pl.BlockSpec((W * Cout, W * Cout), lambda b: (0, 0)),
            ],
            out_specs=pl.BlockSpec((Bt, H, W * Cout), lambda b: (b, 0, 0)),
        ),
        compiler_params=pltpu.CompilerParams(
            dimension_semantics=("parallel",),
        ),
    )(x1, x2, uh, uw, m1, m2, pool)

    # lane-dense (B, H, W*Cout) -> NCHW
    return jnp.transpose(out_flat.reshape(B, H, W, Cout), (0, 3, 1, 2))


# ----------------------------------------------------------------------------
# Independent plain-JAX reference (mirrors the PyTorch module) for validation.
# ----------------------------------------------------------------------------

def _reference_upconv(x1_nchw, x2_nchw, w1, b1, w2, b2, eps=1e-5, slope=0.2):
    _, _, H2, W2 = x2_nchw.shape
    H, W = 2 * H2, 2 * W2

    def idx(n_in, n_out):
        s = jnp.arange(n_out, dtype=jnp.float32) * (n_in - 1) / (n_out - 1)
        i0 = jnp.clip(jnp.floor(s).astype(jnp.int32), 0, n_in - 1)
        i1 = jnp.clip(i0 + 1, 0, n_in - 1)
        return i0, i1, s - i0.astype(jnp.float32)

    h0, h1, fh = idx(H2, H)
    v0, v1, fw = idx(W2, W)
    xa, xb = x2_nchw[:, :, h0, :], x2_nchw[:, :, h1, :]
    xh = xa * (1 - fh)[None, None, :, None] + xb * fh[None, None, :, None]
    ya, yb = xh[:, :, :, v0], xh[:, :, :, v1]
    x2u = ya * (1 - fw)[None, None, None, :] + yb * fw[None, None, None, :]
    x = jnp.concatenate([x1_nchw, x2u], axis=1)

    def block(x, w, b):
        y = lax.conv_general_dilated(
            x, w, (1, 1), ((1, 1), (1, 1)),
            dimension_numbers=("NCHW", "OIHW", "NCHW"),
            precision=lax.Precision.HIGHEST) + b[None, :, None, None]
        m = jnp.mean(y, axis=(2, 3), keepdims=True)
        v = jnp.mean((y - m) ** 2, axis=(2, 3), keepdims=True)
        y = (y - m) * lax.rsqrt(v + eps)
        return jnp.where(y >= 0, y, slope * y)

    return block(block(x, w1, b1), w2, b2)


if __name__ == "__main__":
    key = jax.random.PRNGKey(0)
    k1, k2, k3, k4, k5, k6 = jax.random.split(key, 6)

    # inputs1: (B, C1, H, W); inputs2: (B, C2, H/2, W/2).  in_size = C1 + C2.
    # B=16 so the kernel batch-stacks Bt=8 samples (M=128) across a 2-step grid.
    B, C1, C2, H, W = 16, 4, 4, 16, 16
    in_size, out_size = C1 + C2, 8

    inputs1 = jax.random.normal(k1, (B, C1, H, W), jnp.float32)
    inputs2 = jax.random.normal(k2, (B, C2, H // 2, W // 2), jnp.float32)

    # PyTorch conv parameter shapes: OIHW weights + per-channel bias.
    w1 = 0.1 * jax.random.normal(k3, (out_size, in_size, 3, 3), jnp.float32)
    b1 = 0.1 * jax.random.normal(k4, (out_size,), jnp.float32)
    w2 = 0.1 * jax.random.normal(k5, (out_size, out_size, 3, 3), jnp.float32)
    b2 = 0.1 * jax.random.normal(k6, (out_size,), jnp.float32)

    fwd = jax.jit(up_conv_forward)
    out = jax.block_until_ready(fwd(inputs1, inputs2, w1, b1, w2, b2))
    assert out.shape == (B, out_size, H, W)

    ref = _reference_upconv(inputs1, inputs2, w1, b1, w2, b2)
    # Tolerance covers bf16 MXU operands (f32 accumulation + f32 norm math).
    np.testing.assert_allclose(np.asarray(out), np.asarray(ref),
                               rtol=5e-2, atol=5e-2)
    print("KERNEL_OK")
</pallas_src>

<mosaic_0001>
module attributes {stable_mosaic.version = 11 : i64} {
  func.func private @main(%arg0: i32) attributes {dimension_semantics = [#tpu.dimension_semantics<core_parallel>], iteration_bounds = array<i64: 2>, tpu.core_type = #tpu.core_type<sc_scalar_subcore>, window_params = []} {
    return
  }
}

module attributes {stable_mosaic.version = 11 : i64} {
  func.func private @main(%arg0: i32) attributes {dimension_semantics = [#tpu.dimension_semantics<core_parallel>], iteration_bounds = array<i64: 2>, tpu.core_type = #tpu.core_type<sc_scalar_subcore>, window_params = []} {
    return
  }
}

module attributes {stable_mosaic.version = 11 : i64} {
  func.func @_upconv_fused_kernel(%arg0: i32, %arg1: memref<8x16x64xf32, #tpu.memory_space<vmem>>, %arg2: memref<8x8x32xf32, #tpu.memory_space<vmem>>, %arg3: memref<128x64xbf16, #tpu.memory_space<vmem>>, %arg4: memref<32x64xbf16, #tpu.memory_space<vmem>>, %arg5: memref<3x128x128xbf16, #tpu.memory_space<vmem>>, %arg6: memref<3x128x128xbf16, #tpu.memory_space<vmem>>, %arg7: memref<128x128xf32, #tpu.memory_space<vmem>>, %arg8: memref<8x16x128xf32, #tpu.memory_space<vmem>>) attributes {dimension_semantics = [#tpu.dimension_semantics<parallel>], iteration_bounds = array<i64: 2>, scalar_prefetch = 0 : i64, scratch_operands = 0 : i64, tpu.core_type = #tpu.core_type<tc>, window_params = [{transform_indices = @transform_0, window_bounds = array<i64: 8, 16, 64>}, {transform_indices = @transform_1, window_bounds = array<i64: 8, 8, 32>}, {pipeline_mode = #tpu.pipeline_mode<synchronous>, transform_indices = @transform_2, window_bounds = array<i64: 128, 64>}, {pipeline_mode = #tpu.pipeline_mode<synchronous>, transform_indices = @transform_3, window_bounds = array<i64: 32, 64>}, {pipeline_mode = #tpu.pipeline_mode<synchronous>, transform_indices = @transform_4, window_bounds = array<i64: 3, 128, 128>}, {pipeline_mode = #tpu.pipeline_mode<synchronous>, transform_indices = @transform_5, window_bounds = array<i64: 3, 128, 128>}, {pipeline_mode = #tpu.pipeline_mode<synchronous>, transform_indices = @transform_6, window_bounds = array<i64: 128, 128>}, {transform_indices = @transform_7, window_bounds = array<i64: 8, 16, 128>}]} {
    %0 = tpu.iota {dimensions = array<i32: 0>} : vector<128x1xi32>
    %c16_i32 = arith.constant 16 : i32
    %c0_i32 = arith.constant 0 : i32
    %1 = arith.cmpi eq, %c16_i32, %c0_i32 : i32
    %c1_i32 = arith.constant 1 : i32
    %2 = arith.select %1, %c1_i32, %c16_i32 : i32
    %3 = vector.broadcast %2 : i32 to vector<128x1xi32>
    %4 = arith.remsi %0, %3 : vector<128x1xi32>
    %c0_i32_0 = arith.constant 0 : i32
    %5 = vector.broadcast %c0_i32_0 : i32 to vector<128x1xi32>
    %6 = arith.cmpi ne, %4, %5 : vector<128x1xi32>
    %c0_i32_1 = arith.constant 0 : i32
    %7 = vector.broadcast %c0_i32_1 : i32 to vector<128x1xi32>
    %8 = arith.cmpi slt, %4, %7 : vector<128x1xi32>
    %c0_i32_2 = arith.constant 0 : i32
    %9 = arith.cmpi slt, %2, %c0_i32_2 : i32
    %10 = vector.broadcast %9 : i1 to vector<128x1xi1>
    %11 = vector.broadcast %10 : vector<128x1xi1> to vector<128x1xi1>
    %12 = arith.xori %8, %11 : vector<128x1xi1>
    %13 = arith.andi %12, %6 : vector<128x1xi1>
    %14 = vector.broadcast %2 : i32 to vector<128x1xi32>
    %15 = arith.addi %4, %14 : vector<128x1xi32>
    %16 = arith.select %13, %15, %4 : vector<128x1xi1>, vector<128x1xi32>
    %c0_i32_3 = arith.constant 0 : i32
    %17 = vector.broadcast %c0_i32_3 : i32 to vector<128x1xi32>
    %18 = arith.cmpi ne, %16, %17 : vector<128x1xi32>
    %c16_i32_4 = arith.constant 16 : i32
    %c0_i32_5 = arith.constant 0 : i32
    %19 = arith.cmpi eq, %c16_i32_4, %c0_i32_5 : i32
    %c1_i32_6 = arith.constant 1 : i32
    %20 = arith.select %19, %c1_i32_6, %c16_i32_4 : i32
    %21 = vector.broadcast %20 : i32 to vector<128x1xi32>
    %22 = arith.remsi %0, %21 : vector<128x1xi32>
    %c0_i32_7 = arith.constant 0 : i32
    %23 = vector.broadcast %c0_i32_7 : i32 to vector<128x1xi32>
    %24 = arith.cmpi ne, %22, %23 : vector<128x1xi32>
    %c0_i32_8 = arith.constant 0 : i32
    %25 = vector.broadcast %c0_i32_8 : i32 to vector<128x1xi32>
    %26 = arith.cmpi slt, %22, %25 : vector<128x1xi32>
    %c0_i32_9 = arith.constant 0 : i32
    %27 = arith.cmpi slt, %20, %c0_i32_9 : i32
    %28 = vector.broadcast %27 : i1 to vector<128x1xi1>
    %29 = vector.broadcast %28 : vector<128x1xi1> to vector<128x1xi1>
    %30 = arith.xori %26, %29 : vector<128x1xi1>
    %31 = arith.andi %30, %24 : vector<128x1xi1>
    %32 = vector.broadcast %20 : i32 to vector<128x1xi32>
    %33 = arith.addi %22, %32 : vector<128x1xi32>
    %34 = arith.select %31, %33, %22 : vector<128x1xi1>, vector<128x1xi32>
    %c15_i32 = arith.constant 15 : i32
    %35 = vector.broadcast %c15_i32 : i32 to vector<128x1xi32>
    %36 = arith.cmpi ne, %34, %35 : vector<128x1xi32>
    %c0 = arith.constant 0 : index
    %c0_10 = arith.constant 0 : index
    %37 = vector.load %arg7[%c0, %c0_10] : memref<128x128xf32, #tpu.memory_space<vmem>>, vector<128x128xf32>
    %c0_11 = arith.constant 0 : index
    %c0_12 = arith.constant 0 : index
    %c0_13 = arith.constant 0 : index
    %38 = vector.load %arg2[%c0_11, %c0_12, %c0_13] : memref<8x8x32xf32, #tpu.memory_space<vmem>>, vector<8x8x32xf32>
    %39 = vector.shape_cast %38 : vector<8x8x32xf32> to vector<64x32xf32>
    %40 = arith.truncf %39 : vector<64x32xf32> to vector<64x32xbf16>
    %c0_14 = arith.constant 0 : index
    %c0_15 = arith.constant 0 : index
    %41 = vector.load %arg3[%c0_14, %c0_15] : memref<128x64xbf16, #tpu.memory_space<vmem>>, vector<128x64xbf16>
    %cst = arith.constant dense<0.000000e+00> : vector<128x32xf32>
    %42 = tpu.matmul %41, %40, %cst {dimension_numbers = #tpu.dot_dimension_numbers<[1], [0], [0], [1], [0, 0, 1, 1], [], []>} : vector<128x64xbf16>, vector<64x32xbf16>, vector<128x32xf32> -> vector<128x32xf32>
    %43 = arith.truncf %42 : vector<128x32xf32> to vector<128x32xbf16>
    %c0_16 = arith.constant 0 : index
    %c0_17 = arith.constant 0 : index
    %44 = vector.load %arg4[%c0_16, %c0_17] : memref<32x64xbf16, #tpu.memory_space<vmem>>, vector<32x64xbf16>
    %cst_18 = arith.constant dense<0.000000e+00> : vector<128x64xf32>
    %45 = tpu.matmul %43, %44, %cst_18 {dimension_numbers = #tpu.dot_dimension_numbers<[1], [0], [0], [1], [0, 0, 1, 1], [], []>} : vector<128x32xbf16>, vector<32x64xbf16>, vector<128x64xf32> -> vector<128x64xf32>
    %c0_19 = arith.constant 0 : index
    %c0_20 = arith.constant 0 : index
    %c0_21 = arith.constant 0 : index
    %46 = vector.load %arg1[%c0_19, %c0_20, %c0_21] : memref<8x16x64xf32, #tpu.memory_space<vmem>>, vector<8x16x64xf32>
    %47 = vector.shape_cast %46 : vector<8x16x64xf32> to vector<128x64xf32>
    %48 = arith.truncf %47 : vector<128x64xf32> to vector<128x64xbf16>
    %49 = arith.truncf %45 : vector<128x64xf32> to vector<128x64xbf16>
    %50 = tpu.concatenate %48, %49 in 1 : vector<128x64xbf16>, vector<128x64xbf16> -> vector<128x128xbf16>
    %c1 = arith.constant 1 : index
    %c0_22 = arith.constant 0 : index
    %c0_23 = arith.constant 0 : index
    %51 = vector.load %arg5[%c1, %c0_22, %c0_23] : memref<3x128x128xbf16, #tpu.memory_space<vmem>>, vector<1x128x128xbf16>
    %52 = vector.shape_cast %51 : vector<1x128x128xbf16> to vector<128x128xbf16>
    %cst_24 = arith.constant dense<0.000000e+00> : vector<128x128xf32>
    %53 = tpu.matmul %50, %52, %cst_24 {dimension_numbers = #tpu.dot_dimension_numbers<[1], [0], [0], [1], [0, 0, 1, 1], [], []>} : vector<128x128xbf16>, vector<128x128xbf16>, vector<128x128xf32> -> vector<128x128xf32>
    %c0_25 = arith.constant 0 : index
    %c0_26 = arith.constant 0 : index
    %c0_27 = arith.constant 0 : index
    %54 = vector.load %arg5[%c0_25, %c0_26, %c0_27] : memref<3x128x128xbf16, #tpu.memory_space<vmem>>, vector<1x128x128xbf16>
    %55 = vector.shape_cast %54 : vector<1x128x128xbf16> to vector<128x128xbf16>
    %cst_28 = arith.constant dense<0.000000e+00> : vector<128x128xf32>
    %56 = tpu.matmul %50, %55, %cst_28 {dimension_numbers = #tpu.dot_dimension_numbers<[1], [0], [0], [1], [0, 0, 1, 1], [], []>} : vector<128x128xbf16>, vector<128x128xbf16>, vector<128x128xf32> -> vector<128x128xf32>
    %c1_i32_29 = arith.constant 1 : i32
    %57 = tpu.dynamic_rotate %56 by %c1_i32_29 dim 0 : vector<128x128xf32>, i32 -> vector<128x128xf32>
    %cst_30 = arith.constant 0.000000e+00 : f32
    %58 = vector.shape_cast %18 : vector<128x1xi1> to vector<128x1xi1>
    %59 = vector.broadcast %58 : vector<128x1xi1> to vector<128x128xi1>
    %60 = vector.broadcast %cst_30 : f32 to vector<128x128xf32>
    %61 = arith.select %59, %57, %60 : vector<128x128xi1>, vector<128x128xf32>
    %62 = arith.addf %53, %61 : vector<128x128xf32>
    %c2 = arith.constant 2 : index
    %c0_31 = arith.constant 0 : index
    %c0_32 = arith.constant 0 : index
    %63 = vector.load %arg5[%c2, %c0_31, %c0_32] : memref<3x128x128xbf16, #tpu.memory_space<vmem>>, vector<1x128x128xbf16>
    %64 = vector.shape_cast %63 : vector<1x128x128xbf16> to vector<128x128xbf16>
    %cst_33 = arith.constant dense<0.000000e+00> : vector<128x128xf32>
    %65 = tpu.matmul %50, %64, %cst_33 {dimension_numbers = #tpu.dot_dimension_numbers<[1], [0], [0], [1], [0, 0, 1, 1], [], []>} : vector<128x128xbf16>, vector<128x128xbf16>, vector<128x128xf32> -> vector<128x128xf32>
    %c127_i32 = arith.constant 127 : i32
    %66 = tpu.dynamic_rotate %65 by %c127_i32 dim 0 : vector<128x128xf32>, i32 -> vector<128x128xf32>
    %cst_34 = arith.constant 0.000000e+00 : f32
    %67 = vector.shape_cast %36 : vector<128x1xi1> to vector<128x1xi1>
    %68 = vector.broadcast %67 : vector<128x1xi1> to vector<128x128xi1>
    %69 = vector.broadcast %cst_34 : f32 to vector<128x128xf32>
    %70 = arith.select %68, %66, %69 : vector<128x128xi1>, vector<128x128xf32>
    %71 = arith.addf %62, %70 : vector<128x128xf32>
    %72 = vector.shape_cast %71 : vector<128x128xf32> to vector<8x16x128xf32>
    %cst_35 = arith.constant dense<0.000000e+00> : vector<8x128xf32>
    %73 = vector.multi_reduction <add>, %72, %cst_35 [1] : vector<8x16x128xf32> to vector<8x128xf32>
    %74 = arith.mulf %72, %72 : vector<8x16x128xf32>
    %cst_36 = arith.constant dense<0.000000e+00> : vector<8x128xf32>
    %75 = vector.multi_reduction <add>, %74, %cst_36 [1] : vector<8x16x128xf32> to vector<8x128xf32>
    %cst_37 = arith.constant dense<0.000000e+00> : vector<8x128xf32>
    %76 = tpu.matmul %73, %37, %cst_37 {dimension_numbers = #tpu.dot_dimension_numbers<[1], [0], [0], [1], [0, 0, 1, 1], [], []>} : vector<8x128xf32>, vector<128x128xf32>, vector<8x128xf32> -> vector<8x128xf32>
    %cst_38 = arith.constant 3.906250e-03 : f32
    %77 = vector.broadcast %cst_38 : f32 to vector<8x128xf32>
    %78 = arith.mulf %76, %77 : vector<8x128xf32>
    %cst_39 = arith.constant dense<0.000000e+00> : vector<8x128xf32>
    %79 = tpu.matmul %75, %37, %cst_39 {dimension_numbers = #tpu.dot_dimension_numbers<[1], [0], [0], [1], [0, 0, 1, 1], [], []>} : vector<8x128xf32>, vector<128x128xf32>, vector<8x128xf32> -> vector<8x128xf32>
    %cst_40 = arith.constant 3.906250e-03 : f32
    %80 = vector.broadcast %cst_40 : f32 to vector<8x128xf32>
    %81 = arith.mulf %79, %80 : vector<8x128xf32>
    %82 = arith.mulf %78, %78 : vector<8x128xf32>
    %83 = arith.subf %81, %82 : vector<8x128xf32>
    %cst_41 = arith.constant 0.000000e+00 : f32
    %84 = vector.broadcast %cst_41 : f32 to vector<8x128xf32>
    %85 = arith.maximumf %83, %84 : vector<8x128xf32>
    %cst_42 = arith.constant 9.99999974E-6 : f32
    %86 = vector.broadcast %cst_42 : f32 to vector<8x128xf32>
    %87 = arith.addf %85, %86 : vector<8x128xf32>
    %88 = math.rsqrt %87 : vector<8x128xf32>
    %89 = vector.shape_cast %78 : vector<8x128xf32> to vector<8x1x128xf32>
    %90 = vector.broadcast %89 : vector<8x1x128xf32> to vector<8x16x128xf32>
    %91 = arith.subf %72, %90 : vector<8x16x128xf32>
    %92 = vector.shape_cast %88 : vector<8x128xf32> to vector<8x1x128xf32>
    %93 = vector.broadcast %92 : vector<8x1x128xf32> to vector<8x16x128xf32>
    %94 = arith.mulf %91, %93 : vector<8x16x128xf32>
    %cst_43 = arith.constant 0.000000e+00 : f32
    %95 = vector.broadcast %cst_43 : f32 to vector<8x16x128xf32>
    %96 = arith.cmpf oge, %94, %95 : vector<8x16x128xf32>
    %cst_44 = arith.constant 2.000000e-01 : f32
    %97 = vector.broadcast %cst_44 : f32 to vector<8x16x128xf32>
    %98 = arith.mulf %97, %94 : vector<8x16x128xf32>
    %99 = arith.select %96, %94, %98 : vector<8x16x128xi1>, vector<8x16x128xf32>
    %100 = vector.shape_cast %99 : vector<8x16x128xf32> to vector<128x128xf32>
    %101 = arith.truncf %100 : vector<128x128xf32> to vector<128x128xbf16>
    %c1_45 = arith.constant 1 : index
    %c0_46 = arith.constant 0 : index
    %c0_47 = arith.constant 0 : index
    %102 = vector.load %arg6[%c1_45, %c0_46, %c0_47] : memref<3x128x128xbf16, #tpu.memory_space<vmem>>, vector<1x128x128xbf16>
    %103 = vector.shape_cast %102 : vector<1x128x128xbf16> to vector<128x128xbf16>
    %cst_48 = arith.constant dense<0.000000e+00> : vector<128x128xf32>
    %104 = tpu.matmul %101, %103, %cst_48 {dimension_numbers = #tpu.dot_dimension_numbers<[1], [0], [0], [1], [0, 0, 1, 1], [], []>} : vector<128x128xbf16>, vector<128x128xbf16>, vector<128x128xf32> -> vector<128x128xf32>
    %c0_49 = arith.constant 0 : index
    %c0_50 = arith.constant 0 : index
    %c0_51 = arith.constant 0 : index
    %105 = vector.load %arg6[%c0_49, %c0_50, %c0_51] : memref<3x128x128xbf16, #tpu.memory_space<vmem>>, vector<1x128x128xbf16>
    %106 = vector.shape_cast %105 : vector<1x128x128xbf16> to vector<128x128xbf16>
    %cst_52 = arith.constant dense<0.000000e+00> : vector<128x128xf32>
    %107 = tpu.matmul %101, %106, %cst_52 {dimension_numbers = #tpu.dot_dimension_numbers<[1], [0], [0], [1], [0, 0, 1, 1], [], []>} : vector<128x128xbf16>, vector<128x128xbf16>, vector<128x128xf32> -> vector<128x128xf32>
    %c1_i32_53 = arith.constant 1 : i32
    %108 = tpu.dynamic_rotate %107 by %c1_i32_53 dim 0 : vector<128x128xf32>, i32 -> vector<128x128xf32>
    %cst_54 = arith.constant 0.000000e+00 : f32
    %109 = vector.shape_cast %18 : vector<128x1xi1> to vector<128x1xi1>
    %110 = vector.broadcast %109 : vector<128x1xi1> to vector<128x128xi1>
    %111 = vector.broadcast %cst_54 : f32 to vector<128x128xf32>
    %112 = arith.select %110, %108, %111 : vector<128x128xi1>, vector<128x128xf32>
    %113 = arith.addf %104, %112 : vector<128x128xf32>
    %c2_55 = arith.constant 2 : index
    %c0_56 = arith.constant 0 : index
    %c0_57 = arith.constant 0 : index
    %114 = vector.load %arg6[%c2_55, %c0_56, %c0_57] : memref<3x128x128xbf16, #tpu.memory_space<vmem>>, vector<1x128x128xbf16>
    %115 = vector.shape_cast %114 : vector<1x128x128xbf16> to vector<128x128xbf16>
    %cst_58 = arith.constant dense<0.000000e+00> : vector<128x128xf32>
    %116 = tpu.matmul %101, %115, %cst_58 {dimension_numbers = #tpu.dot_dimension_numbers<[1], [0], [0], [1], [0, 0, 1, 1], [], []>} : vector<128x128xbf16>, vector<128x128xbf16>, vector<128x128xf32> -> vector<128x128xf32>
    %c127_i32_59 = arith.constant 127 : i32
    %117 = tpu.dynamic_rotate %116 by %c127_i32_59 dim 0 : vector<128x128xf32>, i32 -> vector<128x128xf32>
    %cst_60 = arith.constant 0.000000e+00 : f32
    %118 = vector.shape_cast %36 : vector<128x1xi1> to vector<128x1xi1>
    %119 = vector.broadcast %118 : vector<128x1xi1> to vector<128x128xi1>
    %120 = vector.broadcast %cst_60 : f32 to vector<128x128xf32>
    %121 = arith.select %119, %117, %120 : vector<128x128xi1>, vector<128x128xf32>
    %122 = arith.addf %113, %121 : vector<128x128xf32>
    %123 = vector.shape_cast %122 : vector<128x128xf32> to vector<8x16x128xf32>
    %cst_61 = arith.constant dense<0.000000e+00> : vector<8x128xf32>
    %124 = vector.multi_reduction <add>, %123, %cst_61 [1] : vector<8x16x128xf32> to vector<8x128xf32>
    %125 = arith.mulf %123, %123 : vector<8x16x128xf32>
    %cst_62 = arith.constant dense<0.000000e+00> : vector<8x128xf32>
    %126 = vector.multi_reduction <add>, %125, %cst_62 [1] : vector<8x16x128xf32> to vector<8x128xf32>
    %cst_63 = arith.constant dense<0.000000e+00> : vector<8x128xf32>
    %127 = tpu.matmul %124, %37, %cst_63 {dimension_numbers = #tpu.dot_dimension_numbers<[1], [0], [0], [1], [0, 0, 1, 1], [], []>} : vector<8x128xf32>, vector<128x128xf32>, vector<8x128xf32> -> vector<8x128xf32>
    %cst_64 = arith.constant 3.906250e-03 : f32
    %128 = vector.broadcast %cst_64 : f32 to vector<8x128xf32>
    %129 = arith.mulf %127, %128 : vector<8x128xf32>
    %cst_65 = arith.constant dense<0.000000e+00> : vector<8x128xf32>
    %130 = tpu.matmul %126, %37, %cst_65 {dimension_numbers = #tpu.dot_dimension_numbers<[1], [0], [0], [1], [0, 0, 1, 1], [], []>} : vector<8x128xf32>, vector<128x128xf32>, vector<8x128xf32> -> vector<8x128xf32>
    %cst_66 = arith.constant 3.906250e-03 : f32
    %131 = vector.broadcast %cst_66 : f32 to vector<8x128xf32>
    %132 = arith.mulf %130, %131 : vector<8x128xf32>
    %133 = arith.mulf %129, %129 : vector<8x128xf32>
    %134 = arith.subf %132, %133 : vector<8x128xf32>
    %cst_67 = arith.constant 0.000000e+00 : f32
    %135 = vector.broadcast %cst_67 : f32 to vector<8x128xf32>
    %136 = arith.maximumf %134, %135 : vector<8x128xf32>
    %cst_68 = arith.constant 9.99999974E-6 : f32
    %137 = vector.broadcast %cst_68 : f32 to vector<8x128xf32>
    %138 = arith.addf %136, %137 : vector<8x128xf32>
    %139 = math.rsqrt %138 : vector<8x128xf32>
    %140 = vector.shape_cast %129 : vector<8x128xf32> to vector<8x1x128xf32>
    %141 = vector.broadcast %140 : vector<8x1x128xf32> to vector<8x16x128xf32>
    %142 = arith.subf %123, %141 : vector<8x16x128xf32>
    %143 = vector.shape_cast %139 : vector<8x128xf32> to vector<8x1x128xf32>
    %144 = vector.broadcast %143 : vector<8x1x128xf32> to vector<8x16x128xf32>
    %145 = arith.mulf %142, %144 : vector<8x16x128xf32>
    %cst_69 = arith.constant 0.000000e+00 : f32
    %146 = vector.broadcast %cst_69 : f32 to vector<8x16x128xf32>
    %147 = arith.cmpf oge, %145, %146 : vector<8x16x128xf32>
    %cst_70 = arith.constant 2.000000e-01 : f32
    %148 = vector.broadcast %cst_70 : f32 to vector<8x16x128xf32>
    %149 = arith.mulf %148, %145 : vector<8x16x128xf32>
    %150 = arith.select %147, %145, %149 : vector<8x16x128xi1>, vector<8x16x128xf32>
    %151 = vector.shape_cast %150 : vector<8x16x128xf32> to vector<128x128xf32>
    %152 = vector.shape_cast %151 : vector<128x128xf32> to vector<8x16x128xf32>
    %c0_71 = arith.constant 0 : index
    %c0_72 = arith.constant 0 : index
    %c0_73 = arith.constant 0 : index
    %153 = vector.load %arg8[%c0_71, %c0_72, %c0_73] : memref<8x16x128xf32, #tpu.memory_space<vmem>>, vector<8x16x128xf32>
    tpu.vector_store %arg8[%c0_71, %c0_72, %c0_73], %152 {strides = array<i32>} : memref<8x16x128xf32, #tpu.memory_space<vmem>>, vector<8x16x128xf32>,
    return
  }
  func.func @transform_0(%arg0: i32) -> (i32, i32, i32) {
    %c0_i32 = arith.constant 0 : i32
    %c0_i32_0 = arith.constant 0 : i32
    %c0_i32_1 = arith.constant 0 : i32
    return %arg0, %c0_i32, %c0_i32_0 : i32, i32, i32
  }
  func.func @transform_1(%arg0: i32) -> (i32, i32, i32) {
    %c0_i32 = arith.constant 0 : i32
    %c0_i32_0 = arith.constant 0 : i32
    %c0_i32_1 = arith.constant 0 : i32
    return %arg0, %c0_i32, %c0_i32_0 : i32, i32, i32
  }
  func.func @transform_2(%arg0: i32) -> (i32, i32) {
    %c0_i32 = arith.constant 0 : i32
    %c0_i32_0 = arith.constant 0 : i32
    %c0_i32_1 = arith.constant 0 : i32
    return %c0_i32, %c0_i32_0 : i32, i32
  }
  func.func @transform_3(%arg0: i32) -> (i32, i32) {
    %c0_i32 = arith.constant 0 : i32
    %c0_i32_0 = arith.constant 0 : i32
    %c0_i32_1 = arith.constant 0 : i32
    return %c0_i32, %c0_i32_0 : i32, i32
  }
  func.func @transform_4(%arg0: i32) -> (i32, i32, i32) {
    %c0_i32 = arith.constant 0 : i32
    %c0_i32_0 = arith.constant 0 : i32
    %c0_i32_1 = arith.constant 0 : i32
    %c0_i32_2 = arith.constant 0 : i32
    return %c0_i32, %c0_i32_0, %c0_i32_1 : i32, i32, i32
  }
  func.func @transform_5(%arg0: i32) -> (i32, i32, i32) {
    %c0_i32 = arith.constant 0 : i32
    %c0_i32_0 = arith.constant 0 : i32
    %c0_i32_1 = arith.constant 0 : i32
    %c0_i32_2 = arith.constant 0 : i32
    return %c0_i32, %c0_i32_0, %c0_i32_1 : i32, i32, i32
  }
  func.func @transform_6(%arg0: i32) -> (i32, i32) {
    %c0_i32 = arith.constant 0 : i32
    %c0_i32_0 = arith.constant 0 : i32
    %c0_i32_1 = arith.constant 0 : i32
    return %c0_i32, %c0_i32_0 : i32, i32
  }
  func.func @transform_7(%arg0: i32) -> (i32, i32, i32) {
    %c0_i32 = arith.constant 0 : i32
    %c0_i32_0 = arith.constant 0 : i32
    %c0_i32_1 = arith.constant 0 : i32
    return %arg0, %c0_i32, %c0_i32_0 : i32, i32, i32
  }
}

</mosaic_0001>

<bundles_post_ra>
// kernel: up_conv_forward.1
= control target key start
LH: loop header
LB: loop body
LE: loop exit
PB: predicated region body
PF: predicated region fallthrough
CT: control target
= control target key end

     0   :  { %s4427_s24 = smov 0   ;;  %s5645_s0 = inlined_call_operand.vmem [shape: f32[16,16,64], index: 0, kind: input, shape index: {}]   ;;  %s5646_s1 = inlined_call_operand.vmem [shape: f32[16,8,32], index: 1, kind: input, shape index: {}]   ;;  %s5647_s2 = inlined_call_operand.vmem [shape: bf16[128,64], index: 2, kind: input, shape index: {}]   ;;  %s5648_s3 = inlined_call_operand.vmem [shape: bf16[32,64], index: 3, kind: input, shape index: {}]   ;;  %s5649_s4 = inlined_call_operand.vmem [shape: bf16[3,128,128], index: 4, kind: input, shape index: {}]   ;;  %s5650_s5 = inlined_call_operand.vmem [shape: bf16[3,128,128], index: 5, kind: input, shape index: {}]   ;;  %s5651_s6 = inlined_call_operand.vmem [shape: f32[128,128], index: 6, kind: input, shape index: {}]   ;;  %s5652_s7 = inlined_call_operand.vmem [shape: f32[16,16,128], index: 7, kind: output, shape index: {}]  }
   0x1 LB: > { %s3486_s25 = sadd.s32 4294967295, %s4380_s24   ;;  %p3490_p0 = scmp.ge.s32.totalorder %s4380_s24, 1  ;;  %s4380_s24 = sphi %s4427_s24, %s17_s24  }
   0x2   : > { %p250_p1 = scmp.lt.s32.totalorder %s4380_s24, 3 }
   0x4   : > { %p251_p2 = pnand %p3490_p0, %p250_p1 }
   0x6   : > { %254 = sbr.rel (%p251_p2) target bundleno = 1720 (0x6b8), region = 48 }
   0xd   : > { %s3491_s26 = sshll.u32 %s3486_s25, 3  ;;  %v4312_v0 = vld [vmem:[%s5647_s2] sm:$0xff]   ;;  %vm635_vm0 = vcmask 523264   ;;  %v4313_v14 = vld [vmem:[%s5647_s2 + $0x8] sm:$0xff]   ;;  %v4314_v15 = vld [vmem:[%s5647_s2 + $0x10] sm:$0xff]   ;;  %vm781_vm1 = vcmask 261120  }
   0xe   : > { %p290_p3 = scmp.lt.s32.totalorder %s3491_s26, 15  ;;  %3835 = vmatprep.mubr.msk.bf16.mxu0 %vm635_vm0, %v4312_v0  ;;  %v4320_v11 = vld [vmem:[%s5648_s3] sm:$0xff]   ;;  %v4315_v16 = vld [vmem:[%s5647_s2 + $0x18] sm:$0xff]   ;;  %v4317_v18 = vld [vmem:[%s5647_s2 + $0x28] sm:$0xff]   ;;  %s4382_s20 = smov 64   ;;  %vm5666_vm2 = vmmov 0  }
   0xf   : > { %3851 = vmatprep.subr.bf16.mxu1 %v4320_v11  ;;  %v4316_v17 = vld [vmem:[%s5647_s2 + $0x20] sm:$0xff]   ;;  %v4318_v19 = vld [vmem:[%s5647_s2 + $0x30] sm:$0xff]   ;;  %v4319_v20 = vld [vmem:[%s5647_s2 + $0x38] sm:$0xff]  }
  0x10   : > { %s5819_s26 = smov (!%p290_p3, %s3491_s26), 15  ;;  %3852 = vmatpush3.bf16.msra.mxu1 %v4320_v11  ;;  %v4321_v21 = vld [vmem:[%s5648_s3 + $0x8] sm:$0xff]   ;;  %v4322_v46 = vld [vmem:[%s5649_s4] sm:$0xff]   ;;  %v4326_v50 = vld [vmem:[%s5649_s4 + $0x10] sm:$0xff]  }
  0x11   : > { %s3495_s29 = sshll.u32 %s5819_s26, 3  ;;  %3853 = vmatprep.subr.bf16.mxu1 %v4321_v21  ;;  %v4323_v47 = vld [vmem:[%s5649_s4 + $0x40] sm:$0xff]   ;;  %v4324_v48 = vld [vmem:[%s5649_s4 + $0x8] sm:$0xff]   ;;  %v4327_v51 = vld [vmem:[%s5649_s4 + $0x50] sm:$0xff]   ;;  %s3639_s21 = sshll.u32 %s5819_s26, 4 }
  0x12   : > { %s300_s9 = scalar_lea.vmem %s5646_s1, %s3495_s29  ;;  %v4325_v49 = vld [vmem:[%s5649_s4 + $0x48] sm:$0xff]   ;;  %v4328_v52 = vld [vmem:[%s5649_s4 + $0x18] sm:$0xff]   ;;  %v4330_v54 = vld [vmem:[%s5649_s4 + $0x20] sm:$0xff]   ;;  %s4544_s25 = scalar_lea.vmem %s5645_s0, %s3639_s21 }
  0x13   : > { %v567_v1 = vld [vmem:[%s300_s9] sm:$0xff]  ;;  %v568_v2 = vld [vmem:[%s300_s9 + $0x8] sm:$0xff]  ;;  %v569_v3 = vld [vmem:[%s300_s9 + $0x10] sm:$0xff] }
  0x14   : > { %v575_v4 = vpack.c.bf16 %v568_v2, %v567_v1  ;;  %v570_v5 = vld [vmem:[%s300_s9 + $0x18] sm:$0xff]  ;;  %v571_v7 = vld [vmem:[%s300_s9 + $0x20] sm:$0xff]  ;;  %v572_v8 = vld [vmem:[%s300_s9 + $0x28] sm:$0xff]  ;;  %3854 = vmatpush3.bf16.msra.mxu1 %v4321_v21 }
  0x15   : > { %v576_v6 = vpack.c.bf16 %v570_v5, %v569_v3  ;;  %v573_v9 = vld [vmem:[%s300_s9 + $0x30] sm:$0xff]  ;;  %v574_v10 = vld [vmem:[%s300_s9 + $0x38] sm:$0xff]  ;;  %v577_v12 = vpack.c.bf16 %v572_v8, %v571_v7  ;;  %3871 = vmatprep.subr.bf16.mxu1 %v4322_v46  ;;  %v4331_v55 = vld [vmem:[%s5649_s4 + $0x60] sm:$0xff]  }
  0x16   : > { %3827 = vmatprep.subr.bf16.mxu0 %v575_v4  ;;  %v578_v13 = vpack.c.bf16 %v574_v10, %v573_v9  ;;  %v4329_v53 = vld [vmem:[%s5649_s4 + $0x58] sm:$0xff]   ;;  %v4332_v56 = vld [vmem:[%s5649_s4 + $0x28] sm:$0xff]   ;;  %v4334_v58 = vld [vmem:[%s5649_s4 + $0x30] sm:$0xff]  }
  0x17   : > { %3828 = vmatpush3.bf16.msra.mxu0 %v575_v4  ;;  %v4333_v57 = vld [vmem:[%s5649_s4 + $0x68] sm:$0xff]   ;;  %v4335_v59 = vld [vmem:[%s5649_s4 + $0x70] sm:$0xff]   ;;  %v4336_v60 = vld [vmem:[%s5649_s4 + $0x38] sm:$0xff]  }
  0x18   : > { %3829 = vmatprep.subr.bf16.mxu0 %v576_v6  ;;  %v4337_v61 = vld [vmem:[%s5649_s4 + $0x78] sm:$0xff]   ;;  %v4338_v62 = vld [vmem:[%s5649_s4 + $0x80] sm:$0xff]  }
  0x1b   : > { %3830 = vmatpush3.bf16.msra.mxu0 %v576_v6 }
  0x1c   : > { %3831 = vmatprep.subr.bf16.mxu0 %v577_v12 }
  0x1f   : > { %3832 = vmatpush3.bf16.msra.mxu0 %v577_v12 }
  0x20   : > { %3833 = vmatprep.subr.bf16.mxu0 %v578_v13 }
  0x23   : > { %3834 = vmatpush3.bf16.msra.mxu0 %v578_v13 }
  0x24   : > { %3903 = vmatprep.subr.bf16.mxu0 %v4323_v47 }
  0x26   : > { %3836 = vmatmul.mubr.msk.bf16.vlgmr.msra.gmra.mrb[0].mxu0 %vm635_vm0, %v4313_v14 }
  0x27   : > { %3839 = vmatprep.mubr.msk.bf16.mxu0 %vm635_vm0, %v4314_v15  ;;  %3904 = vmatpush3.bf16.msra.mxu0 %v4323_v47 }
  0x28   : > { %3905 = vmatprep.subr.bf16.mxu0 %v4325_v49 }
  0x2b   : > { %3906 = vmatpush3.bf16.msra.mxu0 %v4325_v49  ;;  %v913_v49 = vld [vmem:[%s4544_s25 + $0x50] sm:$0xff] }
  0x2c   : > { %3907 = vmatprep.subr.bf16.mxu0 %v4327_v51 }
  0x2e   : > { %3840 = vmatmul.mubr.msk.bf16.gmra.mrb[4].mxu0 %vm635_vm0, %v4315_v16 }
  0x2f   : > { %3843 = vmatprep.mubr.msk.bf16.mxu0 %vm635_vm0, %v4316_v17  ;;  %3908 = vmatpush3.bf16.msra.mxu0 %v4327_v51 }
  0x30   : > { %3909 = vmatprep.subr.bf16.mxu0 %v4329_v53 }
  0x33   : > { %3910 = vmatpush3.bf16.msra.mxu0 %v4329_v53 }
  0x34   : > { %3911 = vmatprep.subr.bf16.mxu0 %v4331_v55 }
  0x36   : > { %3844 = vmatmul.mubr.msk.bf16.gmra.mrb[8].mxu0 %vm635_vm0, %v4317_v18 }
  0x37   : > { %3847 = vmatprep.mubr.msk.bf16.mxu0 %vm635_vm0, %v4318_v19  ;;  %3912 = vmatpush3.bf16.msra.mxu0 %v4331_v55 }
  0x38   : > { %3913 = vmatprep.subr.bf16.mxu0 %v4333_v57 }
  0x3b   : > { %3914 = vmatpush3.bf16.msra.mxu0 %v4333_v57  ;;  %v916_v57 = vld [vmem:[%s4544_s25 + $0x68] sm:$0xff] }
  0x3c   : > { %3915 = vmatprep.subr.bf16.mxu0 %v4335_v59 }
  0x3e   : > { %3848 = vmatmul.mubr.msk.bf16.gmra.mrb[12].mxu0 %vm635_vm0, %v4319_v20 }
  0x3f   : > { %3916 = vmatpush3.bf16.msra.mxu0 %v4335_v59 }
  0x40   : > { %3917 = vmatprep.subr.bf16.mxu0 %v4337_v61 }
  0x43   : > { %3918 = vmatpush3.bf16.msra.mxu0 %v4337_v61  ;;  %v917_v61 = vld [vmem:[%s4544_s25 + $0x70] sm:$0xff] }
  0xf9   : > { %v3837_v22 = vpop.f32.mrb[0].mxu0 }
  0xfa   : > { %v694_v23 = vpop.f32.mrb[1].mxu0 }
  0xfb   : > { %v3838_v24 = vpop.f32.mrb[2].mxu0 }
  0xfc   : > { %v758_v25 = vpack.c.bf16 %v3838_v24, %v3837_v22  ;;  %v697_v26 = vpop.f32.mrb[3].mxu0  ;;  %v904_v24 = vld [vmem:[%s4544_s25 + $0x8] sm:$0xff] }
  0xfd   : > { %v757_v27 = vpack.c.bf16 %v697_v26, %v694_v23  ;;  %v903_v23 = vld [vmem:[%s4544_s25] sm:$0xff]  ;;  %v905_v26 = vld [vmem:[%s4544_s25 + $0x10] sm:$0xff] }
  0xff   : > { %3855 = vmatprep.mubr.msk.bf16.mxu1 %vm781_vm1, %v757_v27  ;;  %v906_v27 = vld [vmem:[%s4544_s25 + $0x18] sm:$0xff] }
 0x100   : > { %3856 = vmatmul.mubr.msk.bf16.vlgmr.msra.gmra.mrb[0].mxu1 %vm781_vm1, %v758_v25  ;;  %v919_v25 = vpack.c.bf16 %v904_v24, %v903_v23  ;;  %v562_v23 = vld [vmem:[%s5651_s6 + $0x58] sm:$0xff] }
 0x101   : > { %v3841_v28 = vpop.f32.mrb[4].mxu0  ;;  %3872 = vmatpush3.bf16.msra.mxu1 %v4322_v46  ;;  %v4341_v46 = vld [vmem:[%s5649_s4 + $0x98] sm:$0xff]  }
 0x102   : > { %v710_v29 = vpop.f32.mrb[5].mxu0  ;;  %3873 = vmatprep.subr.bf16.mxu1 %v4324_v48 }
 0x103   : > { %v3842_v30 = vpop.f32.mrb[6].mxu0 }
 0x104   : > { %v760_v31 = vpack.c.bf16 %v3842_v30, %v3841_v28  ;;  %v713_v32 = vpop.f32.mrb[7].mxu0  ;;  %v920_v30 = vpack.c.bf16 %v906_v27, %v905_v26  ;;  %v564_v26 = vld [vmem:[%s5651_s6 + $0x68] sm:$0xff]  ;;  %v565_v27 = vld [vmem:[%s5651_s6 + $0x70] sm:$0xff] }
 0x105   : > { %v759_v33 = vpack.c.bf16 %v713_v32, %v710_v29  ;;  %3874 = vmatpush3.bf16.msra.mxu1 %v4324_v48  ;;  %v908_v32 = vld [vmem:[%s4544_s25 + $0x28] sm:$0xff] }
 0x106   : > { %3875 = vmatprep.subr.bf16.mxu1 %v4326_v50 }
 0x107   : > { %3859 = vmatprep.mubr.msk.bf16.mxu1 %vm781_vm1, %v759_v33 }
 0x108   : > { %3860 = vmatmul.mubr.msk.bf16.gmra.mrb[4].mxu1 %vm781_vm1, %v760_v31  ;;  %v907_v31 = vld [vmem:[%s4544_s25 + $0x20] sm:$0xff] }
 0x109   : > { %v3845_v34 = vpop.f32.mrb[8].mxu0  ;;  %3876 = vmatpush3.bf16.msra.mxu1 %v4326_v50  ;;  %v914_v50 = vld [vmem:[%s4544_s25 + $0x58] sm:$0xff] }
 0x10a   : > { %v726_v35 = vpop.f32.mrb[9].mxu0  ;;  %3877 = vmatprep.subr.bf16.mxu1 %v4328_v52 }
 0x10b   : > { %v3846_v36 = vpop.f32.mrb[10].mxu0 }
 0x10c   : > { %v762_v37 = vpack.c.bf16 %v3846_v36, %v3845_v34  ;;  %v729_v38 = vpop.f32.mrb[11].mxu0  ;;  %v4339_v34 = vld [vmem:[%s5649_s4 + $0x88] sm:$0xff]   ;;  %v921_v36 = vpack.c.bf16 %v908_v32, %v907_v31  ;;  %v310_v32 = vlaneseq }
 0x10d   : > { %v761_v39 = vpack.c.bf16 %v729_v38, %v726_v35  ;;  %3878 = vmatpush3.bf16.msra.mxu1 %v4328_v52  ;;  %v910_v38 = vld [vmem:[%s4544_s25 + $0x38] sm:$0xff]  ;;  %v4342_v52 = vld [vmem:[%s5649_s4 + $0xa0] sm:$0xff]  }
 0x10e   : > { %3879 = vmatprep.subr.bf16.mxu1 %v4330_v54 }
 0x10f   : > { %3863 = vmatprep.mubr.msk.bf16.mxu1 %vm781_vm1, %v761_v39 }
 0x110   : > { %3864 = vmatmul.mubr.msk.bf16.gmra.mrb[8].mxu1 %vm781_vm1, %v762_v37  ;;  %v909_v37 = vld [vmem:[%s4544_s25 + $0x30] sm:$0xff] }
 0x111   : > { %v3849_v40 = vpop.f32.mrb[12].mxu0  ;;  %3880 = vmatpush3.bf16.msra.mxu1 %v4330_v54  ;;  %v924_v54 = vpack.c.bf16 %v914_v50, %v913_v49 }
 0x112   : > { %v742_v41 = vpop.f32.mrb[13].mxu0  ;;  %3881 = vmatprep.subr.bf16.mxu1 %v4332_v56 }
 0x113   : > { %v3850_v42 = vpop.f32.mrb[14].mxu0 }
 0x114   : > { %v764_v43 = vpack.c.bf16 %v3850_v42, %v3849_v40  ;;  %v745_v44 = vpop.f32.mrb[15].mxu0  ;;  %v4340_v40 = vld [vmem:[%s5649_s4 + $0x90] sm:$0xff]   ;;  %v922_v42 = vpack.c.bf16 %v910_v38, %v909_v37 }
 0x115   : > { %v763_v45 = vpack.c.bf16 %v745_v44, %v742_v41  ;;  %3882 = vmatpush3.bf16.msra.mxu1 %v4332_v56  ;;  %v912_v44 = vld [vmem:[%s4544_s25 + $0x48] sm:$0xff]  ;;  %v915_v56 = vld [vmem:[%s4544_s25 + $0x60] sm:$0xff] }
 0x116   : > { %3883 = vmatprep.subr.bf16.mxu1 %v4334_v58 }
 0x117   : > { %3867 = vmatprep.mubr.msk.bf16.mxu1 %vm781_vm1, %v763_v45 }
 0x118   : > { %3868 = vmatmul.mubr.msk.bf16.gmra.mrb[12].mxu1 %vm781_vm1, %v764_v43  ;;  %v911_v43 = vld [vmem:[%s4544_s25 + $0x40] sm:$0xff] }
 0x119   : > { %3884 = vmatpush3.bf16.msra.mxu1 %v4334_v58  ;;  %v923_v48 = vpack.c.bf16 %v912_v44, %v911_v43  ;;  %v4343_v58 = vld [vmem:[%s5649_s4 + $0xa8] sm:$0xff]  }
 0x11a   : > { %3885 = vmatprep.subr.bf16.mxu1 %v4336_v60 }
 0x11d   : > { %3886 = vmatpush3.bf16.msra.mxu1 %v4336_v60  ;;  %v925_v60 = vpack.c.bf16 %v916_v57, %v915_v56 }
 0x11e   : > { %3935 = vmatprep.subr.bf16.mxu1 %v4338_v62 }
 0x1d3   : > { %v3857_v63 = vpop.f32.mrb[0].mxu1 }
 0x1d4   : > { %v840_v0 = vpop.f32.mrb[1].mxu1 }
 0x1d5   : > { %v3858_v1 = vpop.f32.mrb[2].mxu1 }
 0x1d6   : > { %v928_v2 = vpack.c.bf16 %v3858_v1, %v3857_v63  ;;  %v843_v3 = vpop.f32.mrb[3].mxu1 }
 0x1d7   : > { %v927_v4 = vpack.c.bf16 %v843_v3, %v840_v0  ;;  %v4344_v0 = vld [vmem:[%s5649_s4 + $0xb0] sm:$0xff]  }
 0x1d9   : > { %943 = vrot.lane.b32.xlu0 %v927_v4, %s4382_s20  ;;  %v4345_v4 = vld [vmem:[%s5649_s4 + $0xb8] sm:$0xff]  }
 0x1db   : > { %v3861_v5 = vpop.f32.mrb[4].mxu1 }
 0x1dc   : > { %v856_v6 = vpop.f32.mrb[5].mxu1 }
 0x1dd   : > { %945 = vrot.lane.b32.xlu0 %v928_v2, %s4382_s20  ;;  %v3862_v7 = vpop.f32.mrb[6].mxu1 }
 0x1de   : > { %v930_v8 = vpack.c.bf16 %v3862_v7, %v3861_v5  ;;  %v859_v9 = vpop.f32.mrb[7].mxu1  ;;  %v552_v7 = vld [vmem:[%s5651_s6 + $0x8] sm:$0xff] }
 0x1df   : > { %v929_v10 = vpack.c.bf16 %v859_v9, %v856_v6  ;;  %v551_v6 = vld [vmem:[%s5651_s6] sm:$0xff]  ;;  %v5655_v9 = vmov 0.0|0.0  }
 0x1e0   : > { %4203 = vmatprep.subr.bf16.mxu0 %v5655_v9 }
 0x1e1   : > { %947 = vrot.lane.b32.xlu1 %v929_v10, %s4382_s20  ;;  %v553_v10 = vld [vmem:[%s5651_s6 + $0x10] sm:$0xff] }
 0x1e3   : > { %v3865_v11 = vpop.f32.mrb[8].mxu1 }
 0x1e4   : > { %v872_v12 = vpop.f32.mrb[9].mxu1 }
 0x1e5   : > { %949 = vrot.lane.b32.xlu1 %v930_v8, %s4382_s20  ;;  %v3866_v13 = vpop.f32.mrb[10].mxu1  ;;  %v4607_v8 = vpack.c.bf16 %v552_v7, %v551_v6 }
 0x1e6   : > { %v932_v14 = vpack.c.bf16 %v3866_v13, %v3865_v11  ;;  %v875_v15 = vpop.f32.mrb[11].mxu1  ;;  %v554_v11 = vld [vmem:[%s5651_s6 + $0x18] sm:$0xff]  ;;  %v555_v13 = vld [vmem:[%s5651_s6 + $0x20] sm:$0xff] }
 0x1e7   : > { %v931_v16 = vpack.c.bf16 %v875_v15, %v872_v12  ;;  %v4621_v12 = vpack.c.bf16 %v554_v11, %v553_v10 }
 0x1e9   : > { %953 = vrot.lane.b32.xlu1 %v932_v14, %s4382_s20  ;;  %951 = vrot.lane.b32.xlu0 %v931_v16, %s4382_s20  ;;  %v556_v14 = vld [vmem:[%s5651_s6 + $0x28] sm:$0xff]  ;;  %v557_v16 = vld [vmem:[%s5651_s6 + $0x30] sm:$0xff] }
 0x1ea   : > { %v4633_v15 = vpack.c.bf16 %v556_v14, %v555_v13  ;;  %v5696_v13 = vmov 0 }
 0x1eb   : > { %v3869_v17 = vpop.f32.mrb[12].mxu1 }
 0x1ec   : > { %v888_v18 = vpop.f32.mrb[13].mxu1 }
 0x1ed   : > { %v3870_v19 = vpop.f32.mrb[14].mxu1 }
 0x1ee   : > { %v934_v20 = vpack.c.bf16 %v3870_v19, %v3869_v17  ;;  %v891_v21 = vpop.f32.mrb[15].mxu1  ;;  %v558_v17 = vld [vmem:[%s5651_s6 + $0x38] sm:$0xff]  ;;  %v559_v19 = vld [vmem:[%s5651_s6 + $0x40] sm:$0xff] }
 0x1ef   : > { %v933_v22 = vpack.c.bf16 %v891_v21, %v888_v18  ;;  %v4645_v18 = vpack.c.bf16 %v558_v17, %v557_v16 }
 0x1f0   : > { %957 = vrot.lane.b32.xlu1 %v934_v20, %s4382_s20  ;;  %v560_v20 = vld [vmem:[%s5651_s6 + $0x48] sm:$0xff] }
 0x1f1   : > { %955 = vrot.lane.b32.xlu0 %v933_v22, %s4382_s20  ;;  %v4657_v21 = vpack.c.bf16 %v560_v20, %v559_v19  ;;  %v561_v22 = vld [vmem:[%s5651_s6 + $0x50] sm:$0xff]  ;;  %s5608_s20 = scalar_lea.vmem %s5652_s7, %s3639_s21 }
 0x1f2   : > { %v4669_v24 = vpack.c.bf16 %v562_v23, %v561_v22 }
 0x24b   : > { %v944_v28 = vpop.permute.xlu0 %943 }
 0x24c   : > { %v4551_v29 = vsel %vm635_vm0, %v919_v25, %v944_v28  ;;  %v563_v25 = vld [vmem:[%s5651_s6 + $0x60] sm:$0xff] }
 0x24d   : > { %3887 = vmatprep.mubr.bf16.mxu1 %v4551_v29  ;;  %3919 = vmatprep.mubr.bf16.mxu0 %v4551_v29  ;;  %v4684_v28 = vpack.c.bf16 %v564_v26, %v563_v25 }
 0x24f   : > { %v946_v33 = vpop.permute.xlu0 %945 }
 0x250   : > { %v4561_v35 = vsel %vm635_vm0, %v920_v30, %v946_v33  ;;  %v5653_v30 = vmov 0.0   ;;  %v4701_v33 = vshrl.u32 %v310_v32, 7 }
 0x251   : > { %3888 = vmatmul.mubr.bf16.vlgmr.msra.gmra.mrb[16].mxu1 %v4561_v35  ;;  %3920 = vmatmul.mubr.bf16.vlgmr.msra.gmra.mrb[16].mxu0 %v4561_v35 }
 0x252   : > { %3936 = vmatpush3.bf16.msra.mxu1 %v4338_v62  ;;  %v918_v62 = vld [vmem:[%s4544_s25 + $0x78] sm:$0xff]  ;;  %4205 = vmatpush3.bf16.msra.mxu0 %v4607_v8  ;;  %vm5665_vm3 = vcmp.lt.s32.totalorder %v4701_v33, 1  ;;  %v317_v50 = vadd.s32 48, %v4701_v33  ;;  %v321_v16 = vadd.s32 80, %v4701_v33  ;;  %vm5676_vm12 = vcmp.lt.s32.totalorder %v4701_v33, 7 }
 0x253   : > { %v948_v39 = vpop.permute.xlu1 %947  ;;  %3937 = vmatprep.subr.bf16.mxu1 %v4339_v34  ;;  %v926_v2 = vpack.c.bf16 %v918_v62, %v917_v61  ;;  %4206 = vmatprep.subr.bf16.mxu0 %v5655_v9 }
 0x254   : > { %v969_v41 = vsel %vm635_vm0, %v921_v36, %v948_v39  ;;  %v373_v61 = vand.u32 15, %v317_v50 }
 0x255   : > { %3891 = vmatprep.mubr.bf16.mxu1 %v969_v41  ;;  %3923 = vmatprep.mubr.bf16.mxu0 %v969_v41 }
 0x256   : > { %3938 = vmatpush3.bf16.msra.mxu1 %v4339_v34  ;;  %4208 = vmatpush3.bf16.msra.mxu0 %v4621_v12  ;;  %v313_v34 = vadd.s32 16, %v4701_v33  ;;  %vm4739_vm6 = vcmp.ne.s32.totalorder %v373_v61, 0 }
 0x257   : > { %v950_v45 = vpop.permute.xlu1 %949  ;;  %3939 = vmatprep.subr.bf16.mxu1 %v4340_v40  ;;  %4209 = vmatprep.subr.bf16.mxu0 %v5655_v9  ;;  %v5697_v13 = vsel %vm4739_vm6, 4294967295, %v5696_v13 }
 0x258   : > { %v973_v47 = vsel %vm635_vm0, %v922_v42, %v950_v45  ;;  %v345_v37 = vand.u32 15, %v313_v34  ;;  %v315_v42 = vadd.s32 32, %v4701_v33  ;;  %5698 = vst [vmem:[#allocation4_spill] sm:$0xff] %v5697_v13 }
 0x259   : > { %3892 = vmatmul.mubr.bf16.gmra.mrb[20].mxu1 %v973_v47  ;;  %3924 = vmatmul.mubr.bf16.gmra.mrb[20].mxu0 %v973_v47 }
 0x25a   : > { %3940 = vmatpush3.bf16.msra.mxu1 %v4340_v40  ;;  %4211 = vmatpush3.bf16.msra.mxu0 %v4633_v15  ;;  %vm4711_vm4 = vcmp.ne.s32.totalorder %v345_v37, 0 }
 0x25b   : > { %v952_v51 = vpop.permute.xlu0 %951  ;;  %3941 = vmatprep.subr.bf16.mxu1 %v4341_v46  ;;  %v954_v55 = vpop.permute.xlu1 %953  ;;  %4212 = vmatprep.subr.bf16.mxu0 %v5655_v9 }
 0x25c   : > { %v977_v53 = vsel %vm635_vm0, %v923_v48, %v952_v51  ;;  %v981_v59 = vsel %vm635_vm0, %v924_v54, %v954_v55  ;;  %v5690_v48 = vmov 0  ;;  %v359_v55 = vand.u32 15, %v315_v42 }
 0x25d   : > { %3895 = vmatprep.mubr.bf16.mxu1 %v977_v53  ;;  %3927 = vmatprep.mubr.bf16.mxu0 %v977_v53  ;;  %v5691_v48 = vsel %vm4711_vm4, 4294967295, %v5690_v48 }
 0x25e   : > { %3942 = vmatpush3.bf16.msra.mxu1 %v4341_v46  ;;  %4214 = vmatpush3.bf16.msra.mxu0 %v4645_v18  ;;  %5692 = vst [vmem:[#allocation2_spill] sm:$0xff] %v5691_v48  ;;  %vm4733_vm5 = vcmp.ne.s32.totalorder %v359_v55, 0 }
 0x25f   : > { %3943 = vmatprep.subr.bf16.mxu1 %v4342_v52  ;;  %4215 = vmatprep.subr.bf16.mxu0 %v5655_v9 }
 0x261   : > { %3896 = vmatmul.mubr.bf16.gmra.mrb[24].mxu1 %v981_v59  ;;  %3928 = vmatmul.mubr.bf16.gmra.mrb[24].mxu0 %v981_v59 }
 0x262   : > { %3944 = vmatpush3.bf16.msra.mxu1 %v4342_v52  ;;  %v958_v3 = vpop.permute.xlu1 %957  ;;  %4217 = vmatpush3.bf16.msra.mxu0 %v4657_v21 }
 0x263   : > { %v956_v63 = vpop.permute.xlu0 %955  ;;  %3945 = vmatprep.subr.bf16.mxu1 %v4343_v58  ;;  %v989_v5 = vsel %vm635_vm0, %v926_v2, %v958_v3  ;;  %4218 = vmatprep.subr.bf16.mxu0 %v5655_v9  ;;  %v5693_v2 = vmov 0 }
 0x264   : > { %v985_v1 = vsel %vm635_vm0, %v925_v60, %v956_v63  ;;  %v5694_v2 = vsel %vm4733_vm5, 4294967295, %v5693_v2 }
 0x265   : > { %3899 = vmatprep.mubr.bf16.mxu1 %v985_v1  ;;  %3931 = vmatprep.mubr.bf16.mxu0 %v985_v1  ;;  %5695 = vst [vmem:[#allocation3_spill] sm:$0xff] %v5694_v2 }
 0x266   : > { %3946 = vmatpush3.bf16.msra.mxu1 %v4343_v58  ;;  %4220 = vmatpush3.bf16.msra.mxu0 %v4669_v24 }
 0x267   : > { %3947 = vmatprep.subr.bf16.mxu1 %v4344_v0  ;;  %4221 = vmatprep.subr.bf16.mxu0 %v5655_v9 }
 0x269   : > { %3900 = vmatmul.mubr.bf16.gmra.mrb[28].mxu1 %v989_v5  ;;  %3932 = vmatmul.mubr.bf16.gmra.mrb[28].mxu0 %v989_v5 }
 0x26a   : > { %3948 = vmatpush3.bf16.msra.mxu1 %v4344_v0  ;;  %3951 = vmatprep.mubr.bf16.mxu1 %v4551_v29  ;;  %v566_v29 = vld [vmem:[%s5651_s6 + $0x78] sm:$0xff]  ;;  %v319_v0 = vadd.s32 64, %v4701_v33 }
 0x26b   : > { %3949 = vmatprep.subr.bf16.mxu1 %v4345_v4  ;;  %3999 = vmatprep.mubr.msk.f32.mxu0 %vm5666_vm2, %v5653_v30  ;;  %v4695_v31 = vpack.c.bf16 %v566_v29, %v565_v27 }
 0x26c   : > { %4223 = vmatpush3.bf16.msra.mxu0 %v4684_v28  ;;  %v387_v20 = vand.u32 15, %v319_v0 }
 0x26d   : > { %4224 = vmatprep.subr.bf16.mxu0 %v5655_v9 }
 0x26e   : > { %3950 = vmatpush3.bf16.msra.mxu1 %v4345_v4  ;;  %vm4763_vm7 = vcmp.ne.s32.totalorder %v387_v20, 0 }
 0x26f   : > { %4227 = vmatprep.subr.bf16.mxu1 %v5655_v9 }
 0x270   : > { %4226 = vmatpush3.bf16.msra.mxu0 %v4695_v31 }
 0x271   : > { %3952 = vmatmul.mubr.bf16.vlgmr.msra.gmra.mrb[32].mxu1 %v4561_v35 }
 0x272   : > { %3955 = vmatprep.mubr.bf16.mxu1 %v969_v41  ;;  %4229 = vmatpush3.bf16.msra.mxu1 %v4607_v8 }
 0x273   : > { %4230 = vmatprep.subr.bf16.mxu1 %v5655_v9 }
 0x276   : > { %4232 = vmatpush3.bf16.msra.mxu1 %v4621_v12 }
 0x277   : > { %4233 = vmatprep.subr.bf16.mxu1 %v5655_v9 }
 0x279   : > { %3956 = vmatmul.mubr.bf16.gmra.mrb[36].mxu1 %v973_v47 }
 0x27a   : > { %3959 = vmatprep.mubr.bf16.mxu1 %v977_v53  ;;  %4235 = vmatpush3.bf16.msra.mxu1 %v4633_v15 }
 0x27b   : > { %4236 = vmatprep.subr.bf16.mxu1 %v5655_v9 }
 0x27e   : > { %4238 = vmatpush3.bf16.msra.mxu1 %v4645_v18 }
 0x27f   : > { %4239 = vmatprep.subr.bf16.mxu1 %v5655_v9 }
 0x281   : > { %3960 = vmatmul.mubr.bf16.gmra.mrb[40].mxu1 %v981_v59 }
 0x282   : > { %3963 = vmatprep.mubr.bf16.mxu1 %v985_v1  ;;  %4241 = vmatpush3.bf16.msra.mxu1 %v4657_v21 }
 0x283   : > { %4242 = vmatprep.subr.bf16.mxu1 %v5655_v9 }
 0x286   : > { %4244 = vmatpush3.bf16.msra.mxu1 %v4669_v24 }
 0x287   : > { %4245 = vmatprep.subr.bf16.mxu1 %v5655_v9 }
 0x289   : > { %3964 = vmatmul.mubr.bf16.gmra.mrb[44].mxu1 %v989_v5 }
 0x28a   : > { %4034 = vmatprep.mubr.msk.f32.mxu1 %vm5666_vm2, %v5653_v30  ;;  %4247 = vmatpush3.bf16.msra.mxu1 %v4684_v28  ;;  %v5726_v30 = vmov 0 }
 0x28b   : > { %4248 = vmatprep.subr.bf16.mxu1 %v5655_v9 }
 0x28e   : > { %4250 = vmatpush3.bf16.msra.mxu1 %v4695_v31 }
 0x324   : > { %v3889_v35 = vpop.f32.mrb[16].mxu1  ;;  %v3921_v36 = vpop.f32.mrb[16].mxu0 }
 0x325   : > { %v4704_v38 = vpop.f32.mrb[17].mxu1  ;;  %v4706_v39 = vpop.f32.mrb[17].mxu0  ;;  %v1171_v43 = vrot.slane %v3889_v35, 7 }
 0x326   : > { %v3890_v40 = vpop.f32.mrb[18].mxu1  ;;  %v3922_v41 = vpop.f32.mrb[18].mxu0  ;;  %v1169_v47 = vrot.slane %v4704_v38, 7 }
 0x327   : > { %v1172_v44 = vrot.slane %v3890_v40, 7  ;;  %v1109_v45 = vpop.f32.mrb[19].mxu1  ;;  %v1335_v46 = vpop.f32.mrb[19].mxu0 }
 0x328   : > { %v1170_v49 = vrot.slane %v1109_v45, 7 }
 0x329   : > { %v1198_v51 = vsel %vm5665_vm3, %v1171_v43, %v1172_v44 }
 0x32a   : > { %v4718_v52 = vadd.f32 %v3922_v41, %v1198_v51  ;;  %v1199_v53 = vsel %vm5665_vm3, %v1170_v49, %v1171_v43  ;;  %v1200_v54 = vsel %vm5665_vm3, %v1169_v47, %v1170_v49  ;;  %v323_v41 = vadd.s32 96, %v4701_v33 }
 0x32b   : > { %v1236_v56 = vsel %vm4711_vm4, %v1199_v53, 0.0  ;;  %v4728_v57 = vadd.f32 %v1335_v46, %v1200_v54  ;;  %v5699_v43 = vmov 0  ;;  %v5702_v54 = vmov 0 }
 0x32c   : > { %v4730_v58 = vadd.f32 %v3921_v36, %v1236_v56  ;;  %v3893_v59 = vpop.f32.mrb[20].mxu1  ;;  %v3925_v60 = vpop.f32.mrb[20].mxu0  ;;  %v401_v36 = vand.u32 15, %v321_v16  ;;  %v5700_v43 = vsel %vm4763_vm7, 4294967295, %v5699_v43  ;;  %v325_v56 = vadd.s32 112, %v4701_v33 }
 0x32d   : > { %v1122_v62 = vpop.f32.mrb[21].mxu1  ;;  %v1348_v63 = vpop.f32.mrb[21].mxu0  ;;  %v1175_v5 = vrot.slane %v3893_v59, 7  ;;  %5701 = vst [vmem:[#allocation5_spill] sm:$0xff] %v5700_v43  ;;  %v415_v61 = vand.u32 15, %v323_v41 }
 0x32e   : > { %v1173_v1 = vrot.slane %v1122_v62, 7  ;;  %v3894_v3 = vpop.f32.mrb[22].mxu1  ;;  %v3926_v4 = vpop.f32.mrb[22].mxu0  ;;  %vm4769_vm8 = vcmp.ne.s32.totalorder %v401_v36, 0 }
 0x32f   : > { %v1176_v6 = vrot.slane %v3894_v3, 7  ;;  %v1125_v7 = vpop.f32.mrb[23].mxu1  ;;  %v1351_v10 = vpop.f32.mrb[23].mxu0  ;;  %v5703_v54 = vsel %vm4769_vm8, 4294967295, %v5702_v54  ;;  %vm4793_vm9 = vcmp.ne.s32.totalorder %v415_v61, 0 }
 0x330   : > { %v1197_v11 = vsel %vm5665_vm3, %v1172_v44, %v1173_v1  ;;  %v1174_v14 = vrot.slane %v1125_v7, 7  ;;  %5704 = vst [vmem:[#allocation6_spill] sm:$0xff] %v5703_v54 }
 0x331   : > { %v1238_v17 = vsel %vm4733_vm5, %v1197_v11, 0.0  ;;  %v1194_v19 = vsel %vm5665_vm3, %v1175_v5, %v1176_v6  ;;  %v429_v11 = vand.u32 15, %v325_v56 }
 0x332   : > { %v4748_v22 = vadd.f32 %v1348_v63, %v1238_v17  ;;  %v4750_v23 = vadd.f32 %v3926_v4, %v1194_v19  ;;  %v1195_v25 = vsel %vm5665_vm3, %v1174_v14, %v1175_v5  ;;  %v1196_v26 = vsel %vm5665_vm3, %v1173_v1, %v1174_v14 }
 0x333   : > { %v1240_v27 = vsel %vm4739_vm6, %v1195_v25, 0.0  ;;  %v4758_v29 = vadd.f32 %v1351_v10, %v1196_v26  ;;  %v331_v5 = vand.u32 15, %v4701_v33  ;;  %v5705_v19 = vmov 0 }
 0x334   : > { %v4760_v32 = vadd.f32 %v3925_v60, %v1240_v27  ;;  %v3897_v34 = vpop.f32.mrb[24].mxu1  ;;  %v3929_v35 = vpop.f32.mrb[24].mxu0  ;;  %v5706_v19 = vsel %vm4793_vm9, 4294967295, %v5705_v19  ;;  %v5708_v27 = vmov 0  ;;  %vm4803_vm11 = vcmp.ne.s32.totalorder %v429_v11, 0 }
 0x335   : > { %v1138_v37 = vpop.f32.mrb[25].mxu1  ;;  %v1364_v40 = vpop.f32.mrb[25].mxu0  ;;  %v1179_v46 = vrot.slane %v3897_v34, 7  ;;  %5707 = vst [vmem:[#allocation7_spill] sm:$0xff] %v5706_v19  ;;  %vm4797_vm10 = vcmp.ne.s32.totalorder %v331_v5, 0  ;;  %v316_v11 = vadd.s32 40, %v4701_v33 }
 0x336   : > { %v1177_v42 = vrot.slane %v1138_v37, 7  ;;  %v3898_v44 = vpop.f32.mrb[26].mxu1  ;;  %v3930_v45 = vpop.f32.mrb[26].mxu0  ;;  %v5709_v27 = vsel %vm4797_vm10, 4294967295, %v5708_v27 }
 0x337   : > { %v1180_v49 = vrot.slane %v3898_v44, 7  ;;  %v1141_v50 = vpop.f32.mrb[27].mxu1  ;;  %v1367_v51 = vpop.f32.mrb[27].mxu0  ;;  %5710 = vst [vmem:[#allocation8_spill] sm:$0xff] %v5709_v27 }
 0x338   : > { %v1193_v53 = vsel %vm5665_vm3, %v1176_v6, %v1177_v42  ;;  %v1178_v55 = vrot.slane %v1141_v50, 7 }
 0x339   : > { %v1242_v59 = vsel %vm4763_vm7, %v1193_v53, 0.0  ;;  %v1190_v60 = vsel %vm5665_vm3, %v1179_v46, %v1180_v49 }
 0x33a   : > { %v4778_v62 = vadd.f32 %v1364_v40, %v1242_v59  ;;  %v4780_v63 = vadd.f32 %v3930_v45, %v1190_v60  ;;  %v1191_v0 = vsel %vm5665_vm3, %v1178_v55, %v1179_v46  ;;  %v1192_v1 = vsel %vm5665_vm3, %v1177_v42, %v1178_v55 }
 0x33b   : > { %v1244_v3 = vsel %vm4769_vm8, %v1191_v0, 0.0  ;;  %v4788_v4 = vadd.f32 %v1367_v51, %v1192_v1  ;;  %v5711_v40 = vmov 0  ;;  %v312_v42 = vadd.s32 8, %v4701_v33 }
 0x33c   : > { %v4791_v6 = vadd.f32 %v3929_v35, %v1244_v3  ;;  %v3901_v7 = vpop.f32.mrb[28].mxu1  ;;  %v3933_v10 = vpop.f32.mrb[28].mxu0  ;;  %v5712_v40 = vsel %vm4803_vm11, 4294967295, %v5711_v40  ;;  %v314_v3 = vadd.s32 24, %v4701_v33 }
 0x33d   : > { %v1154_v14 = vpop.f32.mrb[29].mxu1  ;;  %v1380_v16 = vpop.f32.mrb[29].mxu0  ;;  %v1183_v26 = vrot.slane %v3901_v7, 7  ;;  %5713 = vst [vmem:[#allocation9_spill] sm:$0xff] %v5712_v40  ;;  %v338_v61 = vand.u32 15, %v312_v42 }
 0x33e   : > { %v1181_v17 = vrot.slane %v1154_v14, 7  ;;  %v3902_v20 = vpop.f32.mrb[30].mxu1  ;;  %v3934_v25 = vpop.f32.mrb[30].mxu0 }
 0x33f   : > { %v1184_v34 = vrot.slane %v3902_v20, 7  ;;  %v1157_v35 = vpop.f32.mrb[31].mxu1  ;;  %v1383_v36 = vpop.f32.mrb[31].mxu0  ;;  %vm4839_vm13 = vcmp.ne.s32.totalorder %v338_v61, 15 }
 0x340   : > { %v1189_v37 = vsel %vm5665_vm3, %v1180_v49, %v1181_v17  ;;  %v1182_v41 = vrot.slane %v1157_v35, 7  ;;  %v352_v35 = vand.u32 15, %v314_v3 }
 0x341   : > { %v1246_v44 = vsel %vm4793_vm9, %v1189_v37, 0.0  ;;  %v1201_v45 = vsel %vm5665_vm3, %v1184_v34, %v1169_v47  ;;  %v1186_v46 = vsel %vm5665_vm3, %v1183_v26, %v1184_v34 }
 0x342   : > { %v4816_v50 = vadd.f32 %v1380_v16, %v1246_v44  ;;  %v1234_v49 = vsel %vm4797_vm10, %v1201_v45, 0.0  ;;  %v4820_v51 = vadd.f32 %v3934_v25, %v1186_v46  ;;  %v1187_v53 = vsel %vm5665_vm3, %v1182_v41, %v1183_v26 }
 0x343   : > { %v1333_v55 = vadd.f32 %v4706_v39, %v1234_v49  ;;  %v1248_v38 = vsel %vm4803_vm11, %v1187_v53, 0.0  ;;  %v1188_v47 = vsel %vm5665_vm3, %v1181_v17, %v1182_v41  ;;  %v318_v17 = vadd.s32 56, %v4701_v33 }
 0x344   : > { %v4829_v56 = vadd.f32 %v3933_v10, %v1248_v38  ;;  %v4831_v59 = vadd.f32 %v1383_v36, %v1188_v47  ;;  %v3953_v60 = vpop.f32.mrb[32].mxu1  ;;  %v5714_v10 = vmov 0  ;;  %v366_v41 = vand.u32 15, %v316_v11 }
 0x345   : > { %v4833_v0 = vpop.f32.mrb[33].mxu1  ;;  %v1559_v39 = vrot.slane %v3953_v60, 1  ;;  %v5715_v10 = vsel %vm4839_vm13, 4294967295, %v5714_v10  ;;  %v380_v44 = vand.u32 15, %v318_v17  ;;  %v320_v49 = vadd.s32 72, %v4701_v33 }
 0x346   : > { %v3954_v1 = vpop.f32.mrb[34].mxu1  ;;  %v5657_v14 = vrot.slane %v4833_v0, 1  ;;  %5716 = vst [vmem:[#allocation10_spill] sm:$0xff] %v5715_v10  ;;  %vm4869_vm14 = vcmp.ne.s32.totalorder %v352_v35, 15  ;;  %vm4873_vm15 = vcmp.ne.s32.totalorder %v366_v41, 15  ;;  %v5723_v17 = vmov 0 }
 0x347   : > { %v1560_v5 = vrot.slane %v3954_v1, 1  ;;  %v1497_v7 = vpop.f32.mrb[35].mxu1  ;;  %v5720_v1 = vmov 0  ;;  %vm4879_vm0 = vcmp.ne.s32.totalorder %v380_v44, 15  ;;  %v322_v35 = vadd.s32 88, %v4701_v33 }
 0x348   : > { %v1558_v16 = vrot.slane %v1497_v7, 1  ;;  %v5721_v1 = vsel %vm4873_vm15, 4294967295, %v5720_v1  ;;  %v5724_v17 = vsel %vm4879_vm0, 4294967295, %v5723_v17 }
 0x349   : > { %v1586_v20 = vsel %vm5676_vm12, %v1559_v39, %v1560_v5  ;;  %5722 = vst [vmem:[#allocation12_spill] sm:$0xff] %v5721_v1  ;;  %5725 = vst [vmem:[#allocation13_spill] sm:$0xff] %v5724_v17 }
 0x34a   : > { %v4847_v25 = vadd.f32 %v1586_v20, %v4730_v58  ;;  %v1587_v26 = vsel %vm5676_vm12, %v1558_v16, %v1559_v39  ;;  %v1588_v34 = vsel %vm5676_vm12, %v5657_v14, %v1558_v16 }
 0x34b   : > { %v1623_v36 = vsel %vm4839_vm13, %v1587_v26, 0.0  ;;  %v4857_v37 = vadd.f32 %v1588_v34, %v1333_v55  ;;  %v5717_v55 = vmov 0  ;;  %v394_v34 = vand.u32 15, %v320_v49 }
 0x34c   : > { %v4860_v42 = vadd.f32 %v1623_v36, %v4728_v57  ;;  %v3957_v58 = vpop.f32.mrb[36].mxu1  ;;  %v5718_v55 = vsel %vm4869_vm14, 4294967295, %v5717_v55  ;;  %v1712_v44 = vmul.f32 %v4847_v25, %v4847_v25  ;;  %v326_v49 = vadd.s32 120, %v4701_v33 }
 0x34d   : > { %v1710_v45 = vmul.f32 %v4857_v37, %v4857_v37  ;;  %v1510_v46 = vpop.f32.mrb[37].mxu1  ;;  %5719 = vst [vmem:[#allocation11_spill] sm:$0xff] %v5718_v55  ;;  %v1563_v60 = vrot.slane %v3957_v58, 1  ;;  %vm4913_vm1 = vcmp.ne.s32.totalorder %v394_v34, 15 }
 0x34e   : > { %v1654_v53 = vadd.f32 %v4860_v42, %v4857_v37  ;;  %v1711_v38 = vmul.f32 %v4860_v42, %v4860_v42  ;;  %v1561_v57 = vrot.slane %v1510_v46, 1  ;;  %v3958_v47 = vpop.f32.mrb[38].mxu1  ;;  %v5727_v30 = vsel %vm4913_vm1, 4294967295, %v5726_v30 }
 0x34f   : > { %v1564_v61 = vrot.slane %v3958_v47, 1  ;;  %v1513_v3 = vpop.f32.mrb[39].mxu1  ;;  %5728 = vst [vmem:[#allocation14_spill] sm:$0xff] %v5727_v30 }
 0x350   : > { %v1655_v39 = vrot.slane %v1654_v53, 4  ;;  %v1726_v7 = vadd.f32 %v1711_v38, %v1710_v45  ;;  %v1585_v11 = vsel %vm5676_vm12, %v1560_v5, %v1561_v57  ;;  %v1562_v16 = vrot.slane %v1513_v3, 1 }
 0x351   : > { %v1625_v20 = vsel %vm4869_vm14, %v1585_v11, 0.0  ;;  %v1582_v26 = vsel %vm5676_vm12, %v1563_v60, %v1564_v61  ;;  %v408_v11 = vand.u32 15, %v322_v35 }
 0x352   : > { %v1656_v36 = vadd.f32 %v1655_v39, %v1654_v53  ;;  %v1727_v41 = vrot.slane %v1726_v7, 4  ;;  %v4889_v58 = vadd.f32 %v1625_v20, %v4718_v52  ;;  %v4892_v5 = vadd.f32 %v1582_v26, %v4760_v32 }
 0x353   : > { %v1583_v45 = vsel %vm5676_vm12, %v1562_v16, %v1563_v60  ;;  %v1584_v46 = vsel %vm5676_vm12, %v1561_v57, %v1562_v16  ;;  %v324_v57 = vadd.s32 104, %v4701_v33  ;;  %vm4951_vm3 = vcmp.ne.s32.totalorder %v408_v11, 15 }
 0x354   : > { %v1657_v38 = vrot.slane %v1656_v36, 2  ;;  %v1728_v53 = vadd.f32 %v1727_v41, %v1726_v7  ;;  %v1661_v52 = vadd.f32 %v4889_v58, %v4847_v25  ;;  %v1713_v32 = vmul.f32 %v4889_v58, %v4889_v58  ;;  %v3961_v47 = vpop.f32.mrb[40].mxu1 }
 0x355   : > { %v1627_v3 = vsel %vm4873_vm15, %v1583_v45, 0.0  ;;  %v4908_v39 = vadd.f32 %v1584_v46, %v4748_v22  ;;  %v1526_v60 = vpop.f32.mrb[41].mxu1  ;;  %v1567_v26 = vrot.slane %v3961_v47, 1  ;;  %vm5745_vm15 = vcmask 1043459  }
 0x356   : > { %v1729_v16 = vrot.slane %v1728_v53, 2  ;;  %v1662_v20 = vrot.slane %v1661_v52, 4  ;;  %v1733_v7 = vadd.f32 %v1713_v32, %v1712_v44  ;;  %v4911_v41 = vpop.f32.mrb[42].mxu1  ;;  %v4918_v9 = vadd.f32 %v1627_v3, %v4758_v29 }
 0x357   : > { %v1714_v22 = vmul.f32 %v4908_v39, %v4908_v39  ;;  %v1565_v45 = vrot.slane %v1526_v60, 1  ;;  %v5668_v35 = vrot.slane %v4911_v41, 1  ;;  %v1529_v46 = vpop.f32.mrb[43].mxu1  ;;  %v1658_v14 = vadd.f32 %v1657_v38, %v1656_v36 }
 0x358   : > { %v1663_v1 = vadd.f32 %v1662_v20, %v1661_v52  ;;  %v1734_v44 = vrot.slane %v1733_v7, 4  ;;  %v436_v32 = vand.u32 15, %v326_v49  ;;  %v1668_v34 = vadd.f32 %v4918_v9, %v4908_v39 }
 0x359   : > { %v1715_v47 = vmul.f32 %v4918_v9, %v4918_v9  ;;  %v1581_v29 = vsel %vm5676_vm12, %v1564_v61, %v1565_v45  ;;  %v1578_v3 = vsel %vm5676_vm12, %v1567_v26, %v5668_v35  ;;  %v1730_v60 = vadd.f32 %v1729_v16, %v1728_v53 }
 0x35a   : > { %v1664_v55 = vrot.slane %v1663_v1, 2  ;;  %v1735_v36 = vadd.f32 %v1734_v44, %v1733_v7  ;;  %v422_v38 = vand.u32 15, %v324_v57  ;;  %v1669_v52 = vrot.slane %v1668_v34, 4 }
 0x35b   : > { %v1740_v49 = vadd.f32 %v1715_v47, %v1714_v22  ;;  %v1629_v20 = vsel %vm4879_vm0, %v1581_v29, 0.0  ;;  %v4936_v10 = vadd.f32 %v1578_v3, %v4791_v6  ;;  %v1659_v40 = vrot.slane %v1658_v14, 1 }
 0x35c   : > { %v1665_v27 = vadd.f32 %v1664_v55, %v1663_v1  ;;  %v1736_v61 = vrot.slane %v1735_v36, 2  ;;  %v4939_v19 = vadd.f32 %v1629_v20, %v4750_v23  ;;  %v4941_v54 = vpop.f32.mrb[44].mxu1  ;;  %v1716_v53 = vmul.f32 %v4892_v5, %v4892_v5 }
 0x35d   : > { %v1670_v57 = vadd.f32 %v1669_v52, %v1668_v34  ;;  %v1741_v16 = vrot.slane %v1740_v49, 4  ;;  %v1566_v7 = vrot.slane %v1529_v46, 1  ;;  %v4945_v22 = vpop.f32.mrb[45].mxu1  ;;  %v1731_v44 = vrot.slane %v1730_v60, 1 }
 0x35e   : > { %v1737_v47 = vadd.f32 %v1736_v61, %v1735_v36  ;;  %v1675_v6 = vadd.f32 %v4939_v19, %v4892_v5  ;;  %v1717_v55 = vmul.f32 %v4939_v19, %v4939_v19  ;;  %v5729_v23 = vmov 0  ;;  %v3966_v34 = vpop.f32.mrb[46].mxu1 }
 0x35f   : > { %v5730_v23 = vsel %vm4951_vm3, 4294967295, %v5729_v23  ;;  %vm4955_vm2 = vcmp.ne.s32.totalorder %v436_v32, 15  ;;  %v5732_v1 = vmov 0  ;;  %v1671_v46 = vrot.slane %v1670_v57, 2  ;;  %v1545_v52 = vpop.f32.mrb[47].mxu1 }
 0x360   : > { %5731 = vst [vmem:[#allocation15_spill] sm:$0xff] %v5730_v23  ;;  %v5733_v1 = vsel %vm4955_vm2, 4294967295, %v5732_v1  ;;  %v1742_v29 = vadd.f32 %v1741_v16, %v1740_v49  ;;  %v1579_v3 = vsel %vm5676_vm12, %v1566_v7, %v1567_v26  ;;  %v1580_v36 = vsel %vm5676_vm12, %v1565_v45, %v1566_v7 }
 0x361   : > { %5734 = vst [vmem:[#allocation16_spill] sm:$0xff] %v5733_v1  ;;  %v4963_v20 = vadd.f32 %v1659_v40, %v1658_v14  ;;  %v1666_v11 = vrot.slane %v1665_v27, 1  ;;  %v1676_v61 = vrot.slane %v1675_v6, 4  ;;  %v1747_v35 = vadd.f32 %v1717_v55, %v1716_v53 }
 0x362   : > { %v1672_v17 = vadd.f32 %v1671_v46, %v1670_v57  ;;  %v1743_v32 = vrot.slane %v1742_v29, 2  ;;  %v1631_v43 = vsel %vm4913_vm1, %v1579_v3, 0.0  ;;  %v4968_v13 = vadd.f32 %v1580_v36, %v4778_v62 }
 0x363   : > { %vm4970_vm0 = vcmp.ne.s32.totalorder %v422_v38, 15  ;;  %v5735_v49 = vmov 0  ;;  %v4974_v26 = vadd.f32 %v1731_v44, %v1730_v60  ;;  %v1677_v45 = vadd.f32 %v1676_v61, %v1675_v6 }
 0x364   : > { %v5736_v49 = vsel %vm4970_vm0, 4294967295, %v5735_v49  ;;  %v1748_v40 = vrot.slane %v1747_v35, 4  ;;  %v4977_v14 = vadd.f32 %v1631_v43, %v4788_v4  ;;  %v1738_v53 = vrot.slane %v1737_v47, 1 }
 0x365   : > { %5737 = vst [vmem:[#allocation17_spill] sm:$0xff] %v5736_v49  ;;  %v1673_v57 = vrot.slane %v1672_v17, 1  ;;  %v1720_v16 = vmul.f32 %v4936_v10, %v4936_v10  ;;  %v1718_v62 = vmul.f32 %v4968_v13, %v4968_v13  ;;  %v1744_v7 = vadd.f32 %v1743_v32, %v1742_v29 }
 0x366   : > { %v1678_v38 = vrot.slane %v1677_v45, 2  ;;  %v1682_v55 = vadd.f32 %v4977_v14, %v4968_v13  ;;  %v1719_v60 = vmul.f32 %v4977_v14, %v4977_v14  ;;  %v1667_v44 = vadd.f32 %v1666_v11, %v1665_v27 }
 0x367   : > { %v1571_v43 = vrot.slane %v4941_v54, 1  ;;  %v1569_v4 = vrot.slane %v4945_v22, 1  ;;  %v1572_v6 = vrot.slane %v3966_v34, 1  ;;  %v1749_v3 = vadd.f32 %v1748_v40, %v1747_v35 }
 0x368   : > { %v1679_v46 = vadd.f32 %v1678_v38, %v1677_v45  ;;  %v1683_v36 = vrot.slane %v1682_v55, 4  ;;  %v1754_v61 = vadd.f32 %v1719_v60, %v1718_v62  ;;  %v4989_v30 = vadd.f32 %v1738_v53, %v1737_v47 }
 0x369   : > { %v5738_v29 = vrot.slane %v4911_v41, 1  ;;  %v1574_v2 = vsel %vm5676_vm12, %v1571_v43, %v1572_v6  ;;  %v5739_v27 = vrot.slane %v4833_v0, 1  ;;  %v1674_v22 = vadd.f32 %v1673_v57, %v1672_v17 }
 0x36a   : > { %v1745_v35 = vrot.slane %v1744_v7, 1  ;;  %v1684_v34 = vadd.f32 %v1683_v36, %v1682_v55  ;;  %v1755_v11 = vrot.slane %v1754_v61, 4  ;;  %v5006_v45 = vadd.f32 %v1574_v2, %v4829_v56 }
 0x36b   : > { %v1577_v32 = vsel %vm5676_vm12, %v5738_v29, %v1569_v4  ;;  %v1589_v54 = vsel %vm5676_vm12, %v1572_v6, %v5739_v27  ;;  %v1570_v40 = vrot.slane %v1545_v52, 1  ;;  %v1680_v53 = vrot.slane %v1679_v46, 1 }
 0x36c   : > { %v1633_v47 = vsel %vm4951_vm3, %v1577_v32, 0.0  ;;  %v1637_v41 = vsel %vm4955_vm2, %v1589_v54, 0.0  ;;  %v1750_v0 = vrot.slane %v1749_v3, 2  ;;  %v1685_v62 = vrot.slane %v1684_v34, 2 }
 0x36d   : > { %v1756_v38 = vadd.f32 %v1755_v11, %v1754_v61  ;;  %vm5689_vm12 = vcmask 1042434   ;;  %v5009_v17 = vadd.f32 %v1633_v47, %v4780_v63  ;;  %v5012_v57 = vadd.f32 %v1637_v41, %v4820_v51 }
 0x36e   : > { %v1724_v55 = vmul.f32 %v5006_v45, %v5006_v45  ;;  %vm5740_vm1 = vcmp.lt.s32.totalorder %v4701_v33, 7  ;;  %vm5683_vm2 = vcmask 1043459   ;;  %v1686_v2 = vadd.f32 %v1685_v62, %v1684_v34 }
 0x36f   : > { %v1575_v60 = vsel %vm5740_vm1, %v1570_v40, %v1571_v43  ;;  %v1757_v56 = vrot.slane %v1756_v38, 2  ;;  %vm5741_vm3 = vmmov %vm5740_vm1  ;;  %v1689_v63 = vadd.f32 %v5009_v17, %v4936_v10  ;;  %v1721_v51 = vmul.f32 %v5009_v17, %v5009_v17 }
 0x370   : > { %v1576_v52 = vsel %vm5741_vm3, %v1569_v4, %v1570_v40  ;;  %v1635_v6 = vsel %vm4970_vm0, %v1575_v60, 0.0  ;;  %v1703_v36 = vadd.f32 %v5012_v57, %v5006_v45  ;;  %v1725_v43 = vmul.f32 %v5012_v57, %v5012_v57 }
 0x371   : > { %v1746_v61 = vadd.f32 %v1745_v35, %v1744_v7  ;;  %v1751_v29 = vadd.f32 %v1750_v0, %v1749_v3  ;;  %v5031_v32 = vadd.f32 %v1576_v52, %v4816_v50  ;;  %v5034_v4 = vadd.f32 %v1635_v6, %v4831_v59 }
 0x372   : > { %v1690_v27 = vrot.slane %v1689_v63, 4  ;;  %v1761_v54 = vadd.f32 %v1721_v51, %v1720_v16  ;;  %v1704_v34 = vrot.slane %v1703_v36, 4  ;;  %v1775_v11 = vadd.f32 %v1725_v43, %v1724_v55 }
 0x373   : > { %v1687_v47 = vrot.slane %v1686_v2, 1  ;;  %v1758_v41 = vadd.f32 %v1757_v56, %v1756_v38  ;;  %v1696_v40 = vadd.f32 %v5034_v4, %v5031_v32  ;;  %v1722_v7 = vmul.f32 %v5031_v32, %v5031_v32 }
 0x374   : > { %v1681_v3 = vadd.f32 %v1680_v53, %v1679_v46  ;;  %v1691_v50 = vadd.f32 %v1690_v27, %v1689_v63  ;;  %v1762_v35 = vrot.slane %v1761_v54, 4  ;;  %v1705_v0 = vadd.f32 %v1704_v34, %v1703_v36 }
 0x375   : > { %v1776_v59 = vrot.slane %v1775_v11, 4  ;;  %v1697_v62 = vrot.slane %v1696_v40, 4  ;;  %v1723_v16 = vmul.f32 %v5034_v4, %v5034_v4  ;;  %vm5742_vm3 = vcmask 1041409  }
 0x376   : > { %v1791_v55 = vsel %vm5742_vm3, %v1667_v44, %v4963_v20  ;;  %v1752_v38 = vrot.slane %v1751_v29, 1  ;;  %v1692_v60 = vrot.slane %v1691_v50, 2  ;;  %v1763_v56 = vadd.f32 %v1762_v35, %v1761_v54 }
 0x377   : > { %v1706_v52 = vrot.slane %v1705_v0, 2  ;;  %v1688_v6 = vadd.f32 %v1687_v47, %v1686_v2  ;;  %v1759_v51 = vrot.slane %v1758_v41, 1  ;;  %v1698_v43 = vadd.f32 %v1697_v62, %v1696_v40 }
 0x378   : > { %v1768_v49 = vadd.f32 %v1723_v16, %v1722_v7  ;;  %v1693_v46 = vadd.f32 %v1692_v60, %v1691_v50  ;;  %v1764_v53 = vrot.slane %v1763_v56, 2  ;;  %v1793_v36 = vsel %vm5689_vm12, %v1674_v22, %v1791_v55 }
 0x379   : > { %v1707_v63 = vadd.f32 %v1706_v52, %v1705_v0  ;;  %v1699_v27 = vrot.slane %v1698_v43, 2  ;;  %v1795_v1 = vsel %vm5683_vm2, %v1681_v3, %v1793_v36  ;;  %v1777_v23 = vadd.f32 %v1776_v59, %v1775_v11  ;;  %v4351_v36 = vld [vmem:[%s5650_s5 + $0x50] sm:$0xff]  }
 0x37a   : > { %v1769_v34 = vrot.slane %v1768_v49, 4  ;;  %v1694_v48 = vrot.slane %v1693_v46, 1  ;;  %v1753_v20 = vadd.f32 %v1752_v38, %v1751_v29  ;;  %v1765_v44 = vadd.f32 %v1764_v53, %v1763_v56  ;;  %v4349_v53 = vld [vmem:[%s5650_s5 + $0x48] sm:$0xff]  }
 0x37b   : > { %v1884_v2 = vsel %vm5742_vm3, %v4989_v30, %v4974_v26  ;;  %v1700_v47 = vadd.f32 %v1699_v27, %v1698_v43  ;;  %v1760_v40 = vadd.f32 %v1759_v51, %v1758_v41  ;;  %v1778_v7 = vrot.slane %v1777_v23, 2  ;;  %v4346_v51 = vld [vmem:[%s5650_s5] sm:$0xff]   ;;  %v4352_v27 = vld [vmem:[%s5650_s5 + $0x18] sm:$0xff]  }
 0x37c   : > { %v1770_v54 = vadd.f32 %v1769_v34, %v1768_v49  ;;  %v1695_v50 = vadd.f32 %v1694_v48, %v1693_v46  ;;  %v1708_v35 = vrot.slane %v1707_v63, 1  ;;  %vm5743_vm1 = vcmask 1044484   ;;  %v4347_v43 = vld [vmem:[%s5650_s5 + $0x40] sm:$0xff]   ;;  %4037 = vmatprep.subr.bf16.mxu0 %v4346_v51  ;;  %v4348_v46 = vld [vmem:[%s5650_s5 + $0x8] sm:$0xff]   ;;  %v4353_v34 = vld [vmem:[%s5650_s5 + $0x58] sm:$0xff]  }
 0x37d   : > { %v1797_v22 = vsel %vm5743_vm1, %v1688_v6, %v1795_v1  ;;  %v1766_v0 = vrot.slane %v1765_v44, 1  ;;  %v1701_v62 = vrot.slane %v1700_v47, 1  ;;  %v1779_v3 = vadd.f32 %v1778_v7, %v1777_v23  ;;  %4069 = vmatprep.subr.bf16.mxu1 %v4347_v43  ;;  %v4360_v7 = vld [vmem:[%s5650_s5 + $0x38] sm:$0xff]  }
 0x37e   : > { %v1771_v16 = vrot.slane %v1770_v54, 2  ;;  %v1885_v11 = vsel %vm5689_vm12, %v1746_v61, %v1884_v2  ;;  %vm5744_vm2 = vcmask 1045509   ;;  %vm5688_vm0 = vcmask 1046534   ;;  %v4356_v2 = vld [vmem:[%s5650_s5 + $0x28] sm:$0xff]  }
 0x37f   : > { %v1799_v29 = vsel %vm5744_vm2, %v1695_v50, %v1797_v22  ;;  %v1767_v59 = vadd.f32 %v1766_v0, %v1765_v44  ;;  %v1886_v30 = vsel %vm5745_vm15, %v1753_v20, %v1885_v11  ;;  %v1702_v49 = vadd.f32 %v1701_v62, %v1700_v47  ;;  %vm5746_vm14 = vmmov %vm5744_vm2  ;;  %v4354_v20 = vld [vmem:[%s5650_s5 + $0x20] sm:$0xff]   ;;  %v4358_v47 = vld [vmem:[%s5650_s5 + $0x30] sm:$0xff]  }
 0x380   : > { %vm5687_vm3 = vcmask 1047559   ;;  %v1772_v26 = vadd.f32 %v1771_v16, %v1770_v54  ;;  %v1709_v41 = vadd.f32 %v1708_v35, %v1707_v63  ;;  %v1780_v48 = vrot.slane %v1779_v3, 1  ;;  %v4350_v63 = vld [vmem:[%s5650_s5 + $0x10] sm:$0xff]   ;;  %v4355_v44 = vld [vmem:[%s5650_s5 + $0x60] sm:$0xff]   ;;  %v4357_v54 = vld [vmem:[%s5650_s5 + $0x68] sm:$0xff]  }
 0x381   : > { %v1801_v55 = vsel %vm5688_vm0, %v1702_v49, %v1799_v29  ;;  %v1887_v38 = vsel %vm5743_vm1, %v1760_v40, %v1886_v30  ;;  %v4359_v40 = vld [vmem:[%s5650_s5 + $0x70] sm:$0xff]   ;;  %v4361_v50 = vld [vmem:[%s5650_s5 + $0x78] sm:$0xff]   ;;  %v5110_v35 = vld [vmem:[%s5650_s5 + $0x80] sm:$0xff]   ;;  %v5747_v22 = vmov 0.0|0.0   ;;  %v4386_v0 = vmov 1966171168  }
 0x382   : > { %v1773_v1 = vrot.slane %v1772_v26, 1  ;;  %v1803_v23 = vsel %vm5687_vm3, %v1709_v41, %v1801_v55  ;;  %v1888_v61 = vsel %vm5746_vm14, %v1767_v59, %v1887_v38  ;;  %v1781_v56 = vadd.f32 %v1780_v48, %v1779_v3 }
 0x383   : > { %4000 = vmatmul.mubr.f32.vlgmr.msra.gmra.mrb[32].mxu0 %v1803_v23  ;;  %v1971_v62 = vunpack.c.l.s4 %v4386_v0 }
 0x384   : > { %v1774_v60 = vadd.f32 %v1773_v1, %v1772_v26  ;;  %4038 = vmatpush3.bf16.msra.mxu0 %v4346_v51  ;;  %v5122_v51 = vsub.s32 0, %v4701_v33 }
 0x385   : > { %4039 = vmatprep.subr.bf16.mxu0 %v4348_v46  ;;  %v1972_v3 = vunpack.c.0.s8 %v1971_v62 }
 0x386   : > { %v1889_v52 = vsel %vm5688_vm0, %v1774_v60, %v1888_v61 }
 0x387   : > { %v1890_v6 = vsel %vm5687_vm3, %v1781_v56, %v1889_v52  ;;  %v5115_v59 = vsub.s32 %v1972_v3, %v4701_v33 }
 0x388   : > { %4035 = vmatmul.mubr.f32.vlgmr.msra.gmra.mrb[48].mxu1 %v1890_v6  ;;  %4040 = vmatpush3.bf16.msra.mxu0 %v4348_v46 }
 0x389   : > { %4070 = vmatpush3.bf16.msra.mxu1 %v4347_v43  ;;  %4041 = vmatprep.subr.bf16.mxu0 %v4350_v63 }
 0x38a   : > { %4071 = vmatprep.subr.bf16.mxu1 %v4349_v53 }
 0x38c   : > { %4042 = vmatpush3.bf16.msra.mxu0 %v4350_v63 }
 0x38d   : > { %4072 = vmatpush3.bf16.msra.mxu1 %v4349_v53  ;;  %4043 = vmatprep.subr.bf16.mxu0 %v4352_v27 }
 0x38e   : > { %4073 = vmatprep.subr.bf16.mxu1 %v4351_v36 }
 0x390   : > { %4044 = vmatpush3.bf16.msra.mxu0 %v4352_v27 }
 0x391   : > { %4074 = vmatpush3.bf16.msra.mxu1 %v4351_v36  ;;  %4045 = vmatprep.subr.bf16.mxu0 %v4354_v20 }
 0x392   : > { %4075 = vmatprep.subr.bf16.mxu1 %v4353_v34 }
 0x394   : > { %4046 = vmatpush3.bf16.msra.mxu0 %v4354_v20 }
 0x395   : > { %4076 = vmatpush3.bf16.msra.mxu1 %v4353_v34  ;;  %4047 = vmatprep.subr.bf16.mxu0 %v4356_v2 }
 0x396   : > { %4077 = vmatprep.subr.bf16.mxu1 %v4355_v44 }
 0x398   : > { %4048 = vmatpush3.bf16.msra.mxu0 %v4356_v2 }
 0x399   : > { %4078 = vmatpush3.bf16.msra.mxu1 %v4355_v44  ;;  %4049 = vmatprep.subr.bf16.mxu0 %v4358_v47 }
 0x39a   : > { %4079 = vmatprep.subr.bf16.mxu1 %v4357_v54 }
 0x39c   : > { %4050 = vmatpush3.bf16.msra.mxu0 %v4358_v47 }
 0x39d   : > { %4080 = vmatpush3.bf16.msra.mxu1 %v4357_v54  ;;  %4051 = vmatprep.subr.bf16.mxu0 %v4360_v7 }
 0x39e   : > { %4081 = vmatprep.subr.bf16.mxu1 %v4359_v40 }
 0x3a0   : > { %4052 = vmatpush3.bf16.msra.mxu0 %v4360_v7 }
 0x3a1   : > { %4082 = vmatpush3.bf16.msra.mxu1 %v4359_v40  ;;  %4101 = vmatprep.subr.bf16.mxu0 %v5110_v35 }
 0x3a2   : > { %4083 = vmatprep.subr.bf16.mxu1 %v4361_v50 }
 0x3a5   : > { %4084 = vmatpush3.bf16.msra.mxu1 %v4361_v50 }
 0x3a6   : > { %4251 = vmatprep.subr.bf16.mxu1 %v5747_v22 }
 0x456   : > { %v1871_v16 = vpop.f32.mrb[32].mxu0 }
 0x457   : > { %v1875_v11 = vmul.f32 0.00390625, %v1871_v16  ;;  %v4001_v29 = vpop.f32.mrb[33].mxu0 }
 0x459   : > { %v1963_v49 = vmul.f32 %v1875_v11, %v1875_v11  ;;  %v1976_v48 = vrot.slane %v1875_v11, %v5115_v59  ;;  %v1969_v1 = vcombine.high %v1875_v11, %v1875_v11 }
 0x45b   : > { %v1958_v30 = vpop.f32.mrb[48].mxu1  ;;  %v1984_v38 = vcombine.high %v1976_v48, %v1976_v48  ;;  %v1983_v61 = vrot.slane %v1969_v1, %v5115_v59  ;;  %v1992_v56 = vrot.slane %v1976_v48, %v5115_v59 }
 0x45c   : > { %v1962_v26 = vmul.f32 0.00390625, %v1958_v30  ;;  %v4036_v41 = vpop.f32.mrb[49].mxu1 }
 0x45d   : > { %v2006_v52 = vrot.slane %v1984_v38, %v5115_v59  ;;  %v1985_v6 = vcombine.high %v1983_v61, %v1983_v61  ;;  %v1999_v43 = vrot.slane %v1983_v61, %v5115_v59  ;;  %v2014_v46 = vcombine.high %v1992_v56, %v1992_v56 }
 0x45e   : > { %v1964_v55 = vsub.f32 %v1962_v26, %v1963_v49  ;;  %v2021_v36 = vrot.slane %v1992_v56, %v5122_v51 }
 0x45f   : > { %v2016_v53 = vcombine.high %v2006_v52, %v2006_v52  ;;  %v2013_v63 = vrot.slane %v1985_v6, %v5115_v59  ;;  %v2015_v27 = vcombine.high %v1999_v43, %v1999_v43  ;;  %v2025_v34 = vrot.slane %v2006_v52, %v5122_v51 }
 0x460   : > { %v1965_v23 = vmax.f32 %v1964_v55, 0.0  ;;  %v2029_v20 = vrot.slane %v2014_v46, %v5122_v51  ;;  %v5133_v2 = vrot.slane %v1999_v43, %v5122_v51  ;;  %v2058_v7 = vsub.f32 %v4857_v37, %v2021_v36 }
 0x461   : > { %v5130_v44 = vrot.slane %v2016_v53, %v5122_v51  ;;  %v2017_v47 = vcombine.high %v2013_v63, %v2013_v63  ;;  %v5136_v40 = vrot.slane %v2013_v63, %v5122_v51  ;;  %v2059_v50 = vsub.f32 %v4860_v42, %v2021_v36 }
 0x462   : > { %v1966_v60 = vadd.f32 1e-05, %v1965_v23  ;;  %v5141_v0 = vrot.slane %v2015_v27, %v5122_v51  ;;  %v2060_v62 = vsub.f32 %v4847_v25, %v2025_v34  ;;  %v2061_v11 = vsub.f32 %v4889_v58, %v2025_v34 }
 0x463   : > { %v2062_v29 = vsub.f32 %v4908_v39, %v2029_v20  ;;  %v2063_v30 = vsub.f32 %v4918_v9, %v2029_v20  ;;  %v2064_v49 = vsub.f32 %v4892_v5, %v5130_v44  ;;  %v2065_v26 = vsub.f32 %v4939_v19, %v5130_v44 }
 0x464   : > { %4370 = vrsqrt.f32 %v1966_v60  ;;  %v2066_v41 = vsub.f32 %v4968_v13, %v5133_v2  ;;  %v2067_v58 = vsub.f32 %v4977_v14, %v5133_v2  ;;  %v2068_v9 = vsub.f32 %v4936_v10, %v5136_v40 }
 0x465   : > { %v2069_v5 = vsub.f32 %v5009_v17, %v5136_v40  ;;  %v2070_v13 = vsub.f32 %v5031_v32, %v5141_v0  ;;  %v2071_v14 = vsub.f32 %v5034_v4, %v5141_v0  ;;  %v5170_v38 = vrot.slane %v2017_v47, %v5122_v51 }
 0x467   : > { %v2072_v10 = vsub.f32 %v5006_v45, %v5170_v38  ;;  %v2073_v17 = vsub.f32 %v5012_v57, %v5170_v38 }
 0x46e   : > { %v4371_v54 = vpop.eup %4370 }
 0x46f   : > { %v2075_v16 = vcombine.high %v4371_v54, %v4371_v54  ;;  %v2082_v3 = vrot.slane %v4371_v54, %v5115_v59 }
 0x471   : > { %v2090_v37 = vcombine.high %v2082_v3, %v2082_v3  ;;  %v2098_v42 = vrot.slane %v2082_v3, %v5115_v59  ;;  %v2089_v25 = vrot.slane %v2075_v16, %v5115_v59 }
 0x473   : > { %v2127_v39 = vrot.slane %v2098_v42, %v5122_v51  ;;  %v2112_v48 = vrot.slane %v2090_v37, %v5115_v59  ;;  %v2120_v55 = vcombine.high %v2098_v42, %v2098_v42  ;;  %v2105_v19 = vrot.slane %v2089_v25, %v5115_v59 }
 0x474   : > { %v2091_v1 = vcombine.high %v2089_v25, %v2089_v25 }
 0x475   : > { %v2164_v23 = vmul.f32 %v2127_v39, %v2058_v7  ;;  %v2165_v61 = vmul.f32 %v2127_v39, %v2059_v50  ;;  %v2131_v60 = vrot.slane %v2112_v48, %v5122_v51  ;;  %v2135_v56 = vrot.slane %v2120_v55, %v5122_v51 }
 0x476   : > { %v2122_v52 = vcombine.high %v2112_v48, %v2112_v48  ;;  %v2143_v6 = vrot.slane %v2105_v19, %v5122_v51  ;;  %v5176_v43 = vrot.slane %v2091_v1, %v5115_v59  ;;  %v2121_v46 = vcombine.high %v2105_v19, %v2105_v19  ;;  %v4363_v48 = vld [vmem:[%s5650_s5 + $0x88] sm:$0xff]  }
 0x477   : > { %vm2180_vm2 = vcmp.ge.f32.partialorder %v2164_v23, 0.0  ;;  %vm2181_vm14 = vcmp.ge.f32.partialorder %v2165_v61, 0.0  ;;  %v2196_v53 = vmul.f32 0.2, %v2164_v23  ;;  %v2197_v63 = vmul.f32 0.2, %v2165_v61 }
 0x478   : > { %v2166_v36 = vmul.f32 %v2131_v60, %v2060_v62  ;;  %v2167_v27 = vmul.f32 %v2131_v60, %v2061_v11  ;;  %v2168_v34 = vmul.f32 %v2135_v56, %v2062_v29  ;;  %v2169_v20 = vmul.f32 %v2135_v56, %v2063_v30 }
 0x479   : > { %v2212_v44 = vsel %vm2180_vm2, %v2164_v23, %v2196_v53  ;;  %v2213_v2 = vsel %vm2181_vm14, %v2165_v61, %v2197_v63  ;;  %v2139_v54 = vrot.slane %v2122_v52, %v5122_v51  ;;  %v2172_v47 = vmul.f32 %v2143_v6, %v2066_v41  ;;  %v4364_v52 = vld [vmem:[%s5650_s5 + $0x90] sm:$0xff]  }
 0x47a   : > { %v5179_v7 = vpack.c.bf16 %v2213_v2, %v2212_v44  ;;  %vm2182_vm15 = vcmp.ge.f32.partialorder %v2166_v36, 0.0  ;;  %vm2183_vm1 = vcmp.ge.f32.partialorder %v2167_v27, 0.0  ;;  %v2198_v50 = vmul.f32 0.2, %v2166_v36 }
 0x47b   : > { %v2199_v16 = vmul.f32 0.2, %v2167_v27  ;;  %vm2184_vm3 = vcmp.ge.f32.partialorder %v2168_v34, 0.0  ;;  %vm2185_vm0 = vcmp.ge.f32.partialorder %v2169_v20, 0.0  ;;  %v2200_v3 = vmul.f32 0.2, %v2168_v34 }
 0x47c   : > { %4053 = vmatprep.mubr.bf16.mxu0 %v5179_v7  ;;  %4085 = vmatprep.mubr.bf16.mxu1 %v5179_v7  ;;  %v2214_v62 = vsel %vm2182_vm15, %v2166_v36, %v2198_v50  ;;  %v2201_v11 = vmul.f32 0.2, %v2169_v20  ;;  %v2170_v29 = vmul.f32 %v2139_v54, %v2064_v49  ;;  %v2171_v30 = vmul.f32 %v2139_v54, %v2065_v26  ;;  %v4366_v54 = vld [vmem:[%s5650_s5 + $0xa0] sm:$0xff]  }
 0x47d   : > { %v2215_v37 = vsel %vm2183_vm1, %v2167_v27, %v2199_v16  ;;  %v2216_v42 = vsel %vm2184_vm3, %v2168_v34, %v2200_v3  ;;  %v2173_v25 = vmul.f32 %v2143_v6, %v2067_v58  ;;  %vm2188_vm2 = vcmp.ge.f32.partialorder %v2172_v47, 0.0  ;;  %v4365_v27 = vld [vmem:[%s5650_s5 + $0x98] sm:$0xff]  }
 0x47e   : > { %v5183_v41 = vpack.c.bf16 %v2215_v37, %v2214_v62  ;;  %v2217_v39 = vsel %vm2185_vm0, %v2169_v20, %v2201_v11  ;;  %vm2186_vm14 = vcmp.ge.f32.partialorder %v2170_v29, 0.0  ;;  %vm2187_vm12 = vcmp.ge.f32.partialorder %v2171_v30, 0.0  ;;  %v4367_v62 = vld [vmem:[%s5650_s5 + $0xa8] sm:$0xff]   ;;  %v4368_v11 = vld [vmem:[%s5650_s5 + $0xb0] sm:$0xff]  }
 0x47f   : > { %v5188_v55 = vpack.c.bf16 %v2217_v39, %v2216_v42  ;;  %v2202_v19 = vmul.f32 0.2, %v2170_v29  ;;  %v2203_v1 = vmul.f32 0.2, %v2171_v30  ;;  %vm2189_vm15 = vcmp.ge.f32.partialorder %v2173_v25, 0.0 }
 0x480   : > { %4054 = vmatmul.mubr.bf16.vlgmr.msra.gmra.mrb[36].mxu0 %v5183_v41  ;;  %4086 = vmatmul.mubr.bf16.vlgmr.msra.gmra.mrb[52].mxu1 %v5183_v41  ;;  %v2204_v49 = vmul.f32 0.2, %v2172_v47  ;;  %v2205_v26 = vmul.f32 0.2, %v2173_v25  ;;  %v2147_v58 = vrot.slane %v5176_v43, %v5122_v51  ;;  %v2151_v23 = vrot.slane %v2121_v46, %v5122_v51 }
 0x481   : > { %4102 = vmatpush3.bf16.msra.mxu0 %v5110_v35  ;;  %4057 = vmatprep.mubr.bf16.mxu0 %v5188_v55  ;;  %v2218_v61 = vsel %vm2186_vm14, %v2170_v29, %v2202_v19  ;;  %v2219_v60 = vsel %vm2187_vm12, %v2171_v30, %v2203_v1  ;;  %v2123_v56 = vcombine.high %v5176_v43, %v5176_v43  ;;  %v4369_v29 = vld [vmem:[%s5650_s5 + $0xb8] sm:$0xff]   ;;  %v5748_v30 = vmov 0.0  }
 0x482   : > { %4089 = vmatprep.mubr.bf16.mxu1 %v5188_v55  ;;  %4103 = vmatprep.subr.bf16.mxu0 %v4363_v48  ;;  %v5203_v6 = vpack.c.bf16 %v2219_v60, %v2218_v61  ;;  %v2220_v46 = vsel %vm2188_vm2, %v2172_v47, %v2204_v49  ;;  %v2221_v35 = vsel %vm2189_vm15, %v2173_v25, %v2205_v26  ;;  %vm5749_vm15 = vmmov 0  }
 0x483   : > { %v5207_v53 = vpack.c.bf16 %v2221_v35, %v2220_v46  ;;  %v2174_v63 = vmul.f32 %v2147_v58, %v2068_v9  ;;  %v2175_v43 = vmul.f32 %v2147_v58, %v2069_v5  ;;  %v2176_v36 = vmul.f32 %v2151_v23, %v2070_v13  ;;  %4253 = vmatpush3.bf16.msra.mxu1 %v4607_v8 }
 0x484   : > { %v2177_v34 = vmul.f32 %v2151_v23, %v2071_v14  ;;  %v2155_v40 = vrot.slane %v2123_v56, %v5122_v51  ;;  %4254 = vmatprep.subr.bf16.mxu1 %v5747_v22 }
 0x485   : > { %4104 = vmatpush3.bf16.msra.mxu0 %v4363_v48  ;;  %vm2190_vm12 = vcmp.ge.f32.partialorder %v2174_v63, 0.0  ;;  %vm2191_vm0 = vcmp.ge.f32.partialorder %v2175_v43, 0.0  ;;  %v2206_v32 = vmul.f32 0.2, %v2174_v63  ;;  %v2207_v9 = vmul.f32 0.2, %v2175_v43 }
 0x486   : > { %4105 = vmatprep.subr.bf16.mxu0 %v4364_v52  ;;  %vm2192_vm3 = vcmp.ge.f32.partialorder %v2176_v36, 0.0  ;;  %vm2193_vm1 = vcmp.ge.f32.partialorder %v2177_v34, 0.0  ;;  %v2208_v4 = vmul.f32 0.2, %v2176_v36  ;;  %v2209_v0 = vmul.f32 0.2, %v2177_v34 }
 0x487   : > { %v2222_v5 = vsel %vm2190_vm12, %v2174_v63, %v2206_v32  ;;  %v2223_v13 = vsel %vm2191_vm0, %v2175_v43, %v2207_v9  ;;  %v2178_v45 = vmul.f32 %v2155_v40, %v2072_v10  ;;  %v2179_v14 = vmul.f32 %v2155_v40, %v2073_v17  ;;  %4256 = vmatpush3.bf16.msra.mxu1 %v4621_v12 }
 0x488   : > { %4058 = vmatmul.mubr.bf16.gmra.mrb[40].mxu0 %v5203_v6  ;;  %4090 = vmatmul.mubr.bf16.gmra.mrb[56].mxu1 %v5203_v6  ;;  %v2233_v57 = vpack.c.bf16 %v2223_v13, %v2222_v5  ;;  %v2224_v38 = vsel %vm2192_vm3, %v2176_v36, %v2208_v4  ;;  %v2225_v20 = vsel %vm2193_vm1, %v2177_v34, %v2209_v0  ;;  %vm5750_vm12 = vcmp.lt.s32.totalorder %v4701_v33, 1 }
 0x489   : > { %4106 = vmatpush3.bf16.msra.mxu0 %v4364_v52  ;;  %4061 = vmatprep.mubr.bf16.mxu0 %v5207_v53  ;;  %v2234_v44 = vpack.c.bf16 %v2225_v20, %v2224_v38  ;;  %vm2194_vm2 = vcmp.ge.f32.partialorder %v2178_v45, 0.0  ;;  %vm2195_vm14 = vcmp.ge.f32.partialorder %v2179_v14, 0.0  ;;  %v2210_v2 = vmul.f32 0.2, %v2178_v45  ;;  %vm5751_vm0 = vmmov %vm5750_vm12 }
 0x48a   : > { %4093 = vmatprep.mubr.bf16.mxu1 %v5207_v53  ;;  %4107 = vmatprep.subr.bf16.mxu0 %v4365_v27  ;;  %v2211_v47 = vmul.f32 0.2, %v2179_v14  ;;  %vm5752_vm3 = vmmov %vm5751_vm0 }
 0x48b   : > { %v2226_v50 = vsel %vm2194_vm2, %v2178_v45, %v2210_v2  ;;  %4257 = vmatprep.subr.bf16.mxu1 %v5747_v22  ;;  %vm5754_vm1 = vmmov %vm5751_vm0 }
 0x48c   : > { %v2227_v16 = vsel %vm2195_vm14, %v2179_v14, %v2211_v47  ;;  %4259 = vmatpush3.bf16.msra.mxu1 %v4633_v15  ;;  %vm5757_vm2 = vmmov %vm5751_vm0 }
 0x48d   : > { %4108 = vmatpush3.bf16.msra.mxu0 %v4365_v27  ;;  %v2235_v3 = vpack.c.bf16 %v2227_v16, %v2226_v50  ;;  %4260 = vmatprep.subr.bf16.mxu1 %v5747_v22  ;;  %vm5758_vm14 = vmmov %vm5751_vm0 }
 0x48e   : > { %4109 = vmatprep.subr.bf16.mxu0 %v4366_v54 }
 0x490   : > { %4062 = vmatmul.mubr.bf16.gmra.mrb[44].mxu0 %v2233_v57  ;;  %4094 = vmatmul.mubr.bf16.gmra.mrb[60].mxu1 %v2233_v57 }
 0x491   : > { %4110 = vmatpush3.bf16.msra.mxu0 %v4366_v54  ;;  %4065 = vmatprep.mubr.bf16.mxu0 %v2234_v44 }
 0x492   : > { %4097 = vmatprep.mubr.bf16.mxu1 %v2234_v44  ;;  %4111 = vmatprep.subr.bf16.mxu0 %v4367_v62 }
 0x493   : > { %4262 = vmatpush3.bf16.msra.mxu1 %v4645_v18 }
 0x494   : > { %4263 = vmatprep.subr.bf16.mxu1 %v5747_v22 }
 0x495   : > { %4112 = vmatpush3.bf16.msra.mxu0 %v4367_v62 }
 0x496   : > { %4113 = vmatprep.subr.bf16.mxu0 %v4368_v11 }
 0x497   : > { %4265 = vmatpush3.bf16.msra.mxu1 %v4657_v21 }
 0x498   : > { %4066 = vmatmul.mubr.bf16.gmra.mrb[48].mxu0 %v2235_v3  ;;  %4098 = vmatmul.mubr.bf16.gmra.mrb[64].mxu1 %v2235_v3 }
 0x499   : > { %4114 = vmatpush3.bf16.msra.mxu0 %v4368_v11  ;;  %4117 = vmatprep.mubr.bf16.mxu0 %v5179_v7 }
 0x49a   : > { %4115 = vmatprep.subr.bf16.mxu0 %v4369_v29  ;;  %4266 = vmatprep.subr.bf16.mxu1 %v5747_v22 }
 0x49b   : > { %4268 = vmatpush3.bf16.msra.mxu1 %v4669_v24  ;;  %4165 = vmatprep.mubr.msk.f32.mxu1 %vm5749_vm15, %v5748_v30 }
 0x49c   : > { %4269 = vmatprep.subr.bf16.mxu1 %v5747_v22 }
 0x49d   : > { %4116 = vmatpush3.bf16.msra.mxu0 %v4369_v29 }
 0x49e   : > { %4275 = vmatprep.subr.bf16.mxu0 %v5747_v22 }
 0x49f   : > { %4271 = vmatpush3.bf16.msra.mxu1 %v4684_v28 }
 0x4a0   : > { %4118 = vmatmul.mubr.bf16.vlgmr.msra.gmra.mrb[52].mxu0 %v5183_v41  ;;  %4272 = vmatprep.subr.bf16.mxu1 %v5747_v22 }
 0x4a1   : > { %4121 = vmatprep.mubr.bf16.mxu0 %v5188_v55  ;;  %4277 = vmatpush3.bf16.msra.mxu0 %v4607_v8 }
 0x4a2   : > { %4278 = vmatprep.subr.bf16.mxu0 %v5747_v22 }
 0x4a3   : > { %4274 = vmatpush3.bf16.msra.mxu1 %v4695_v31 }
 0x4a5   : > { %4280 = vmatpush3.bf16.msra.mxu0 %v4621_v12 }
 0x4a6   : > { %4281 = vmatprep.subr.bf16.mxu0 %v5747_v22 }
 0x4a8   : > { %4122 = vmatmul.mubr.bf16.gmra.mrb[56].mxu0 %v5203_v6 }
 0x4a9   : > { %4125 = vmatprep.mubr.bf16.mxu0 %v5207_v53  ;;  %4283 = vmatpush3.bf16.msra.mxu0 %v4633_v15 }
 0x4aa   : > { %4284 = vmatprep.subr.bf16.mxu0 %v5747_v22 }
 0x4ad   : > { %4286 = vmatpush3.bf16.msra.mxu0 %v4645_v18 }
 0x4ae   : > { %4287 = vmatprep.subr.bf16.mxu0 %v5747_v22 }
 0x4b0   : > { %4126 = vmatmul.mubr.bf16.gmra.mrb[60].mxu0 %v2233_v57 }
 0x4b1   : > { %4129 = vmatprep.mubr.bf16.mxu0 %v2234_v44  ;;  %4289 = vmatpush3.bf16.msra.mxu0 %v4657_v21 }
 0x4b2   : > { %4290 = vmatprep.subr.bf16.mxu0 %v5747_v22 }
 0x4b5   : > { %4292 = vmatpush3.bf16.msra.mxu0 %v4669_v24 }
 0x4b6   : > { %4293 = vmatprep.subr.bf16.mxu0 %v5747_v22 }
 0x4b8   : > { %4130 = vmatmul.mubr.bf16.gmra.mrb[64].mxu0 %v2235_v3 }
 0x4b9   : > { %4295 = vmatpush3.bf16.msra.mxu0 %v4684_v28  ;;  %4200 = vmatprep.mubr.msk.f32.mxu0 %vm5749_vm15, %v5748_v30  ;;  %vm5763_vm15 = vmmov %vm5751_vm0 }
 0x4ba   : > { %4296 = vmatprep.subr.bf16.mxu0 %v5747_v22 }
 0x4bd   : > { %4298 = vmatpush3.bf16.msra.mxu0 %v4695_v31 }
 0x553   : > { %v4055_v8 = vpop.f32.mrb[36].mxu0  ;;  %v4087_v12 = vpop.f32.mrb[52].mxu1 }
 0x554   : > { %v5285_v15 = vpop.f32.mrb[37].mxu0  ;;  %v5287_v18 = vpop.f32.mrb[53].mxu1  ;;  %v2416_v7 = vrot.slane %v4055_v8, 7 }
 0x555   : > { %v4056_v21 = vpop.f32.mrb[38].mxu0  ;;  %v4088_v24 = vpop.f32.mrb[54].mxu1  ;;  %v2414_v28 = vrot.slane %v5285_v15, 7 }
 0x556   : > { %v2417_v37 = vrot.slane %v4056_v21, 7  ;;  %v2354_v42 = vpop.f32.mrb[39].mxu0  ;;  %v2547_v25 = vpop.f32.mrb[55].mxu1 }
 0x557   : > { %v2415_v41 = vrot.slane %v2354_v42, 7 }
 0x558   : > { %v2442_v22 = vsel %vm5750_vm12, %v2416_v7, %v2417_v37  ;;  %vm5764_vm12 = vmmov %vm5751_vm0 }
 0x559   : > { %v5292_v39 = vadd.f32 %v4088_v24, %v2442_v22  ;;  %v2443_v31 = vsel %vm5751_vm0, %v2415_v41, %v2416_v7  ;;  %v2444_v48 = vsel %vm5752_vm3, %v2414_v28, %v2415_v41  ;;  %vm5770_vm3 = vmmov %vm5751_vm0 }
 0x55a   : > { %v2448_v19 = vsel %vm4711_vm4, %v2443_v31, 0.0  ;;  %v5302_v1 = vadd.f32 %v2547_v25, %v2444_v48  ;;  %vm5756_vm4 = vmmov %vm5751_vm0 }
 0x55b   : > { %v5304_v49 = vadd.f32 %v4087_v12, %v2448_v19  ;;  %v4059_v26 = vpop.f32.mrb[40].mxu0  ;;  %v4091_v58 = vpop.f32.mrb[56].mxu1 }
 0x55c   : > { %v2367_v23 = vpop.f32.mrb[41].mxu0  ;;  %v2560_v61 = vpop.f32.mrb[57].mxu1  ;;  %v2420_v6 = vrot.slane %v4059_v26, 7 }
 0x55d   : > { %v2418_v60 = vrot.slane %v2367_v23, 7  ;;  %v4060_v56 = vpop.f32.mrb[42].mxu0  ;;  %v4092_v52 = vpop.f32.mrb[58].mxu1 }
 0x55e   : > { %v2421_v46 = vrot.slane %v4060_v56, 7  ;;  %v2370_v35 = vpop.f32.mrb[43].mxu0  ;;  %v2563_v53 = vpop.f32.mrb[59].mxu1 }
 0x55f   : > { %v2441_v63 = vsel %vm5754_vm1, %v2417_v37, %v2418_v60  ;;  %v2419_v43 = vrot.slane %v2370_v35, 7 }
 0x560   : > { %v2450_v27 = vsel %vm4733_vm5, %v2441_v63, 0.0  ;;  %v2438_v34 = vsel %vm5756_vm4, %v2420_v6, %v2421_v46  ;;  %vm5760_vm5 = vmmov %vm5751_vm0 }
 0x561   : > { %v5312_v10 = vadd.f32 %v2560_v61, %v2450_v27  ;;  %v5314_v17 = vadd.f32 %v4092_v52, %v2438_v34  ;;  %v2439_v40 = vsel %vm5757_vm2, %v2419_v43, %v2420_v6  ;;  %v2440_v32 = vsel %vm5758_vm14, %v2418_v60, %v2419_v43 }
 0x562   : > { %v2452_v4 = vsel %vm4739_vm6, %v2439_v40, 0.0  ;;  %v5322_v0 = vadd.f32 %v2563_v53, %v2440_v32  ;;  %vm5762_vm6 = vmmov %vm5751_vm0 }
 0x563   : > { %v5324_v5 = vadd.f32 %v4091_v58, %v2452_v4  ;;  %v4063_v13 = vpop.f32.mrb[44].mxu0  ;;  %v4095_v45 = vpop.f32.mrb[60].mxu1 }
 0x564   : > { %v2383_v14 = vpop.f32.mrb[45].mxu0  ;;  %v2576_v57 = vpop.f32.mrb[61].mxu1  ;;  %v2424_v2 = vrot.slane %v4063_v13, 7 }
 0x565   : > { %v2422_v38 = vrot.slane %v2383_v14, 7  ;;  %v4064_v20 = vpop.f32.mrb[46].mxu0  ;;  %v4096_v44 = vpop.f32.mrb[62].mxu1 }
 0x566   : > { %v2425_v54 = vrot.slane %v4064_v20, 7  ;;  %v2386_v47 = vpop.f32.mrb[47].mxu0  ;;  %v2579_v50 = vpop.f32.mrb[63].mxu1 }
 0x567   : > { %v2437_v16 = vsel %vm5760_vm5, %v2421_v46, %v2422_v38  ;;  %v2423_v3 = vrot.slane %v2386_v47, 7 }
 0x568   : > { %v2454_v11 = vsel %vm4763_vm7, %v2437_v16, 0.0  ;;  %v2434_v29 = vsel %vm5762_vm6, %v2424_v2, %v2425_v54  ;;  %vm5766_vm7 = vmmov %vm5751_vm0 }
 0x569   : > { %v5332_v30 = vadd.f32 %v2576_v57, %v2454_v11  ;;  %v5334_v8 = vadd.f32 %v4096_v44, %v2434_v29  ;;  %v2435_v12 = vsel %vm5763_vm15, %v2423_v3, %v2424_v2  ;;  %v2436_v21 = vsel %vm5764_vm12, %v2422_v38, %v2423_v3 }
 0x56a   : > { %v2456_v7 = vsel %vm4769_vm8, %v2435_v12, 0.0  ;;  %v5342_v37 = vadd.f32 %v2579_v50, %v2436_v21  ;;  %vm5768_vm8 = vmmov %vm5751_vm0 }
 0x56b   : > { %v5344_v42 = vadd.f32 %v4095_v45, %v2456_v7  ;;  %v4067_v25 = vpop.f32.mrb[48].mxu0  ;;  %v4099_v41 = vpop.f32.mrb[64].mxu1 }
 0x56c   : > { %v2399_v22 = vpop.f32.mrb[49].mxu0  ;;  %v2592_v31 = vpop.f32.mrb[65].mxu1  ;;  %v2428_v26 = vrot.slane %v4067_v25, 7 }
 0x56d   : > { %v2426_v48 = vrot.slane %v2399_v22, 7  ;;  %v4068_v55 = vpop.f32.mrb[50].mxu0  ;;  %v4100_v19 = vpop.f32.mrb[66].mxu1 }
 0x56e   : > { %v2429_v58 = vrot.slane %v4068_v55, 7  ;;  %v2402_v23 = vpop.f32.mrb[51].mxu0  ;;  %v2595_v61 = vpop.f32.mrb[67].mxu1 }
 0x56f   : > { %v2433_v60 = vsel %vm5766_vm7, %v2425_v54, %v2426_v48  ;;  %v2427_v56 = vrot.slane %v2402_v23, 7 }
 0x570   : > { %v2458_v6 = vsel %vm4793_vm9, %v2433_v60, 0.0  ;;  %v2445_v46 = vsel %vm5768_vm8, %v2429_v58, %v2414_v28  ;;  %v2430_v35 = vsel %vm5751_vm0, %v2428_v26, %v2429_v58  ;;  %vm5772_vm9 = vmmov %vm5751_vm0 }
 0x571   : > { %v5356_v53 = vadd.f32 %v2592_v31, %v2458_v6  ;;  %v2446_v43 = vsel %vm4797_vm10, %v2445_v46, 0.0  ;;  %v5360_v36 = vadd.f32 %v4100_v19, %v2430_v35  ;;  %v2431_v27 = vsel %vm5770_vm3, %v2427_v56, %v2428_v26  ;;  %v5778_v19 = vld [vmem:[#allocation11_spill] sm:$0xff] }
 0x572   : > { %v2545_v34 = vadd.f32 %v5287_v18, %v2446_v43  ;;  %v2460_v15 = vsel %vm4803_vm11, %v2431_v27, 0.0  ;;  %v2432_v28 = vsel %vm5772_vm9, %v2426_v48, %v2427_v56  ;;  %vm5773_vm10 = vcmp.lt.s32.totalorder %v4701_v33, 7 }
 0x573   : > { %v5369_v32 = vadd.f32 %v4099_v41, %v2460_v15  ;;  %v5371_v9 = vadd.f32 %v2595_v61, %v2432_v28  ;;  %v4119_v4 = vpop.f32.mrb[52].mxu0  ;;  %vm5774_vm11 = vmmov %vm5773_vm10  ;;  %vm5779_vm4 = vnez %v5778_v19 }
 0x574   : > { %v5373_v13 = vpop.f32.mrb[53].mxu0  ;;  %v2771_v14 = vrot.slane %v4119_v4, 1  ;;  %vm5775_vm1 = vmmov %vm5773_vm10 }
 0x575   : > { %v4120_v45 = vpop.f32.mrb[54].mxu0  ;;  %v2769_v20 = vrot.slane %v5373_v13, 1  ;;  %vm5780_vm2 = vmmov %vm5775_vm1 }
 0x576   : > { %v2772_v57 = vrot.slane %v4120_v45, 1  ;;  %v2709_v38 = vpop.f32.mrb[55].mxu0  ;;  %vm5781_vm14 = vmmov %vm5775_vm1 }
 0x577   : > { %v2770_v18 = vrot.slane %v2709_v38, 1  ;;  %vm5782_vm5 = vmmov %vm5775_vm1 }
 0x578   : > { %v2797_v44 = vsel %vm5773_vm10, %v2771_v14, %v2772_v57  ;;  %vm5785_vm15 = vmmov %vm5775_vm1 }
 0x579   : > { %v5379_v2 = vadd.f32 %v2797_v44, %v5304_v49  ;;  %v2798_v54 = vsel %vm5774_vm11, %v2770_v18, %v2771_v14  ;;  %v2799_v47 = vsel %vm5775_vm1, %v2769_v20, %v2770_v18  ;;  %vm5786_vm12 = vmmov %vm5775_vm1 }
 0x57a   : > { %v2802_v16 = vsel %vm4839_vm13, %v2798_v54, 0.0  ;;  %v5389_v3 = vadd.f32 %v2799_v47, %v2545_v34  ;;  %vm5777_vm13 = vmmov %vm5775_vm1 }
 0x57b   : > { %v5392_v62 = vadd.f32 %v2802_v16, %v5302_v1  ;;  %v4123_v11 = vpop.f32.mrb[56].mxu0  ;;  %v2891_v52 = vmul.f32 %v5379_v2, %v5379_v2  ;;  %vm5789_vm8 = vmmov %vm5775_vm1 }
 0x57c   : > { %v2889_v49 = vmul.f32 %v5389_v3, %v5389_v3  ;;  %v2722_v29 = vpop.f32.mrb[57].mxu0  ;;  %v2775_v25 = vrot.slane %v4123_v11, 1  ;;  %vm5790_vm0 = vmmov %vm5775_vm1 }
 0x57d   : > { %v2833_v12 = vadd.f32 %v5392_v62, %v5389_v3  ;;  %v2890_v21 = vmul.f32 %v5392_v62, %v5392_v62  ;;  %v2773_v24 = vrot.slane %v2722_v29, 1  ;;  %v4124_v7 = vpop.f32.mrb[58].mxu0  ;;  %vm5793_vm9 = vmmov %vm5790_vm0 }
 0x57e   : > { %v2776_v41 = vrot.slane %v4124_v7, 1  ;;  %v2725_v22 = vpop.f32.mrb[59].mxu0  ;;  %vm5794_vm10 = vmmov %vm5790_vm0 }
 0x57f   : > { %v2834_v31 = vrot.slane %v2833_v12, 4  ;;  %v2905_v48 = vadd.f32 %v2890_v21, %v2889_v49  ;;  %v2796_v1 = vsel %vm5777_vm13, %v2772_v57, %v2773_v24  ;;  %v2774_v55 = vrot.slane %v2725_v22, 1  ;;  %v5787_v22 = vld [vmem:[#allocation13_spill] sm:$0xff]  ;;  %vm5795_vm11 = vmmov %vm5790_vm0 }
 0x580   : > { %v2804_v26 = vsel %vm5779_vm4, %v2796_v1, 0.0  ;;  %v2793_v58 = vsel %vm5780_vm2, %v2775_v25, %v2776_v41  ;;  %vm5788_vm7 = vnez %v5787_v22  ;;  %vm5800_vm4 = vmmov %vm5790_vm0 }
 0x581   : > { %v2835_v23 = vadd.f32 %v2834_v31, %v2833_v12  ;;  %v2906_v61 = vrot.slane %v2905_v48, 4  ;;  %v5407_v60 = vadd.f32 %v2804_v26, %v5292_v39  ;;  %v5410_v56 = vadd.f32 %v2793_v58, %v5324_v5  ;;  %v5783_v5 = vld [vmem:[#allocation12_spill] sm:$0xff]  ;;  %vm5801_vm2 = vmmov %vm5790_vm0 }
 0x582   : > { %v2794_v6 = vsel %vm5781_vm14, %v2774_v55, %v2775_v25  ;;  %v2795_v46 = vsel %vm5782_vm5, %v2773_v24, %v2774_v55  ;;  %vm5784_vm6 = vnez %v5783_v5  ;;  %vm5804_vm5 = vcmask 1041409  }
 0x583   : > { %v2836_v35 = vrot.slane %v2835_v23, 2  ;;  %v2907_v63 = vadd.f32 %v2906_v61, %v2905_v48  ;;  %v2840_v43 = vadd.f32 %v5407_v60, %v5379_v2  ;;  %v2892_v39 = vmul.f32 %v5407_v60, %v5407_v60  ;;  %v4127_v27 = vpop.f32.mrb[60].mxu0 }
 0x584   : > { %v2806_v34 = vsel %vm5784_vm6, %v2794_v6, 0.0  ;;  %v5425_v40 = vadd.f32 %v2795_v46, %v5312_v10  ;;  %v2738_v15 = vpop.f32.mrb[61].mxu0  ;;  %v2779_v14 = vrot.slane %v4127_v27, 1  ;;  %v2895_v58 = vmul.f32 %v5410_v56, %v5410_v56 }
 0x585   : > { %v2908_v28 = vrot.slane %v2907_v63, 2  ;;  %v2841_v4 = vrot.slane %v2840_v43, 4  ;;  %v2912_v45 = vadd.f32 %v2892_v39, %v2891_v52  ;;  %v5427_v57 = vpop.f32.mrb[62].mxu0  ;;  %v5430_v38 = vadd.f32 %v2806_v34, %v5322_v0 }
 0x586   : > { %v2893_v18 = vmul.f32 %v5425_v40, %v5425_v40  ;;  %v2777_v44 = vrot.slane %v2738_v15, 1  ;;  %v2780_v54 = vrot.slane %v5427_v57, 1  ;;  %v2741_v47 = vpop.f32.mrb[63].mxu0  ;;  %v2837_v50 = vadd.f32 %v2836_v35, %v2835_v23 }
 0x587   : > { %v2842_v10 = vadd.f32 %v2841_v4, %v2840_v43  ;;  %v2913_v16 = vrot.slane %v2912_v45, 4  ;;  %v2847_v11 = vadd.f32 %v5430_v38, %v5425_v40  ;;  %v2894_v49 = vmul.f32 %v5430_v38, %v5430_v38 }
 0x588   : > { %v2792_v0 = vsel %vm5785_vm15, %v2776_v41, %v2777_v44  ;;  %v2789_v29 = vsel %vm5786_vm12, %v2779_v14, %v2780_v54  ;;  %v2909_v12 = vadd.f32 %v2908_v28, %v2907_v63  ;;  %v2838_v1 = vrot.slane %v2837_v50, 1  ;;  %vm5807_vm12 = vmmov %vm5804_vm5 }
 0x589   : > { %v2843_v21 = vrot.slane %v2842_v10, 2  ;;  %v2914_v24 = vadd.f32 %v2913_v16, %v2912_v45  ;;  %v2848_v7 = vrot.slane %v2847_v11, 4  ;;  %v2919_v25 = vadd.f32 %v2894_v49, %v2893_v18 }
 0x58a   : > { %v2808_v31 = vsel %vm5788_vm7, %v2792_v0, 0.0  ;;  %v5448_v48 = vadd.f32 %v2789_v29, %v5344_v42  ;;  %v2778_v52 = vrot.slane %v2741_v47, 1  ;;  %v2910_v46 = vrot.slane %v2909_v12, 1 }
 0x58b   : > { %v2844_v55 = vadd.f32 %v2843_v21, %v2842_v10  ;;  %v2915_v19 = vrot.slane %v2914_v24, 2  ;;  %v5451_v41 = vadd.f32 %v2808_v31, %v5314_v17  ;;  %v5453_v26 = vpop.f32.mrb[64].mxu0  ;;  %v2849_v23 = vadd.f32 %v2848_v7, %v2847_v11  ;;  %v5791_v10 = vld [vmem:[#allocation14_spill] sm:$0xff] }
 0x58c   : > { %v2920_v61 = vrot.slane %v2919_v25, 4  ;;  %v5457_v6 = vpop.f32.mrb[65].mxu0  ;;  %v2790_v27 = vsel %vm5789_vm8, %v2778_v52, %v2779_v14  ;;  %v2791_v5 = vsel %vm5790_vm0, %v2777_v44, %v2778_v52  ;;  %v5467_v15 = vadd.f32 %v2838_v1, %v2837_v50 }
 0x58d   : > { %v2916_v35 = vadd.f32 %v2915_v19, %v2914_v24  ;;  %v2854_v42 = vadd.f32 %v5451_v41, %v5410_v56  ;;  %v2896_v63 = vmul.f32 %v5451_v41, %v5451_v41  ;;  %v4132_v17 = vpop.f32.mrb[66].mxu0  ;;  %v2850_v43 = vrot.slane %v2849_v23, 2 }
 0x58e   : > { %v2921_v39 = vadd.f32 %v2920_v61, %v2919_v25  ;;  %v2757_v34 = vpop.f32.mrb[67].mxu0  ;;  %v2845_v28 = vrot.slane %v2844_v55, 1  ;;  %vm5792_vm3 = vnez %v5791_v10  ;;  %v5472_v11 = vadd.f32 %v2791_v5, %v5332_v30 }
 0x58f   : > { %v2855_v4 = vrot.slane %v2854_v42, 4  ;;  %v2926_v45 = vadd.f32 %v2896_v63, %v2895_v58  ;;  %v2851_v18 = vadd.f32 %v2850_v43, %v2849_v23  ;;  %v2810_v16 = vsel %vm5792_vm3, %v2790_v27, 0.0  ;;  %v5796_v43 = vld [vmem:[#allocation15_spill] sm:$0xff] }
 0x590   : > { %v2922_v47 = vrot.slane %v2921_v39, 2  ;;  %v5474_v49 = vadd.f32 %v2910_v46, %v2909_v12  ;;  %v5477_v44 = vadd.f32 %v2810_v16, %v5342_v37  ;;  %v2917_v50 = vrot.slane %v2916_v35, 1  ;;  %v5802_v16 = vld [vmem:[#allocation17_spill] sm:$0xff] }
 0x591   : > { %v2856_v14 = vadd.f32 %v2855_v4, %v2854_v42  ;;  %v2927_v0 = vrot.slane %v2926_v45, 4  ;;  %v2852_v29 = vrot.slane %v2851_v18, 1  ;;  %v2899_v21 = vmul.f32 %v5448_v48, %v5448_v48 }
 0x592   : > { %v2897_v24 = vmul.f32 %v5472_v11, %v5472_v11  ;;  %v2923_v7 = vadd.f32 %v2922_v47, %v2921_v39  ;;  %v2861_v30 = vadd.f32 %v5477_v44, %v5472_v11  ;;  %v2898_v12 = vmul.f32 %v5477_v44, %v5477_v44  ;;  %v5798_v39 = vld [vmem:[#allocation16_spill] sm:$0xff] }
 0x593   : > { %v2857_v25 = vrot.slane %v2856_v14, 2  ;;  %v2846_v22 = vadd.f32 %v2845_v28, %v2844_v55  ;;  %v2783_v37 = vrot.slane %v5453_v26, 1  ;;  %v2781_v31 = vrot.slane %v5457_v6, 1 }
 0x594   : > { %v2784_v1 = vrot.slane %v4132_v17, 1  ;;  %v2928_v58 = vadd.f32 %v2927_v0, %v2926_v45  ;;  %v2862_v23 = vrot.slane %v2861_v30, 4  ;;  %v2933_v61 = vadd.f32 %v2898_v12, %v2897_v24 }
 0x595   : > { %v2858_v19 = vadd.f32 %v2857_v25, %v2856_v14  ;;  %v5489_v52 = vadd.f32 %v2917_v50, %v2916_v35  ;;  %v2788_v46 = vsel %vm5793_vm9, %v2780_v54, %v2781_v31  ;;  %v2853_v26 = vadd.f32 %v2852_v29, %v2851_v18 }
 0x596   : > { %v2785_v42 = vsel %vm5794_vm10, %v2783_v37, %v2784_v1  ;;  %v2800_v55 = vsel %vm5795_vm11, %v2784_v1, %v2769_v20  ;;  %v2924_v6 = vrot.slane %v2923_v7, 1  ;;  %v2863_v63 = vadd.f32 %v2862_v23, %v2861_v30 }
 0x597   : > { %v2934_v17 = vrot.slane %v2933_v61, 4  ;;  %vm5797_vm1 = vnez %v5796_v43  ;;  %vm5799_vm13 = vnez %v5798_v39  ;;  %v5506_v54 = vadd.f32 %v2785_v42, %v5369_v32 }
 0x598   : > { %v2812_v35 = vsel %vm5797_vm1, %v2788_v46, 0.0  ;;  %v2816_v57 = vsel %vm5799_vm13, %v2800_v55, 0.0  ;;  %v2782_v27 = vrot.slane %v2757_v34, 1  ;;  %v2859_v5 = vrot.slane %v2858_v19, 1 }
 0x599   : > { %v2929_v28 = vrot.slane %v2928_v58, 2  ;;  %v2864_v13 = vrot.slane %v2863_v63, 2  ;;  %v2935_v4 = vadd.f32 %v2934_v17, %v2933_v61  ;;  %v5509_v20 = vadd.f32 %v2812_v35, %v5334_v8 }
 0x59a   : > { %v5512_v45 = vadd.f32 %v2816_v57, %v5360_v36  ;;  %v2903_v18 = vmul.f32 %v5506_v54, %v5506_v54  ;;  %v2786_v47 = vsel %vm5800_vm4, %v2782_v27, %v2783_v37  ;;  %v2787_v34 = vsel %vm5801_vm2, %v2781_v31, %v2782_v27 }
 0x59b   : > { %v2865_v10 = vadd.f32 %v2864_v13, %v2863_v63  ;;  %v2936_v32 = vrot.slane %v2935_v4, 2  ;;  %vm5803_vm14 = vnez %v5802_v16  ;;  %v2868_v8 = vadd.f32 %v5509_v20, %v5448_v48 }
 0x59c   : > { %v2814_v14 = vsel %vm5803_vm14, %v2786_v47, 0.0  ;;  %v2900_v36 = vmul.f32 %v5509_v20, %v5509_v20  ;;  %v2882_v0 = vadd.f32 %v5512_v45, %v5506_v54  ;;  %v2904_v50 = vmul.f32 %v5512_v45, %v5512_v45 }
 0x59d   : > { %v2925_v29 = vadd.f32 %v2924_v6, %v2923_v7  ;;  %v2930_v24 = vadd.f32 %v2929_v28, %v2928_v58  ;;  %v5531_v33 = vadd.f32 %v2787_v34, %v5356_v53  ;;  %v5534_v25 = vadd.f32 %v2814_v14, %v5371_v9 }
 0x59e   : > { %v2869_v30 = vrot.slane %v2868_v8, 4  ;;  %v2940_v12 = vadd.f32 %v2900_v36, %v2899_v21  ;;  %v2883_v37 = vrot.slane %v2882_v0, 4  ;;  %v2954_v31 = vadd.f32 %v2904_v50, %v2903_v18 }
 0x59f   : > { %v2866_v1 = vrot.slane %v2865_v10, 1  ;;  %v2937_v23 = vadd.f32 %v2936_v32, %v2935_v4  ;;  %v2875_v61 = vadd.f32 %v5534_v25, %v5531_v33  ;;  %v2901_v46 = vmul.f32 %v5531_v33, %v5531_v33 }
 0x5a0   : > { %v2860_v7 = vadd.f32 %v2859_v5, %v2858_v19  ;;  %v2870_v58 = vadd.f32 %v2869_v30, %v2868_v8  ;;  %v2941_v42 = vrot.slane %v2940_v12, 4  ;;  %v2884_v53 = vadd.f32 %v2883_v37, %v2882_v0 }
 0x5a1   : > { %v2955_v55 = vrot.slane %v2954_v31, 4  ;;  %v2876_v6 = vrot.slane %v2875_v61, 4  ;;  %v2902_v9 = vmul.f32 %v5534_v25, %v5534_v25  ;;  %v2969_v21 = vsel %vm5804_vm5, %v2846_v22, %v5467_v15 }
 0x5a2   : > { %v2931_v63 = vrot.slane %v2930_v24, 1  ;;  %v2871_v17 = vrot.slane %v2870_v58, 2  ;;  %v2942_v43 = vadd.f32 %v2941_v42, %v2940_v12  ;;  %v2885_v35 = vrot.slane %v2884_v53, 2 }
 0x5a3   : > { %v2867_v39 = vadd.f32 %v2866_v1, %v2865_v10  ;;  %v2938_v57 = vrot.slane %v2937_v23, 1  ;;  %v2877_v27 = vadd.f32 %v2876_v6, %v2875_v61  ;;  %v2947_v28 = vadd.f32 %v2902_v9, %v2901_v46 }
 0x5a4   : > { %v2872_v19 = vadd.f32 %v2871_v17, %v2870_v58  ;;  %v2943_v5 = vrot.slane %v2942_v43, 2  ;;  %v2886_v13 = vadd.f32 %v2885_v35, %v2884_v53  ;;  %vm5805_vm6 = vcmask 1042434  }
 0x5a5   : > { %v2970_v4 = vsel %vm5805_vm6, %v2853_v26, %v2969_v21  ;;  %v2878_v18 = vrot.slane %v2877_v27, 2  ;;  %v2948_v47 = vrot.slane %v2947_v28, 4  ;;  %vm5806_vm15 = vcmask 1043459   ;;  %vm5809_vm8 = vmmov %vm5805_vm6 }
 0x5a6   : > { %v2971_v32 = vsel %vm5806_vm15, %v2860_v7, %v2970_v4  ;;  %v2956_v34 = vadd.f32 %v2955_v55, %v2954_v31  ;;  %v2873_v16 = vrot.slane %v2872_v19, 1  ;;  %v2932_v15 = vadd.f32 %v2931_v63, %v2930_v24  ;;  %vm5811_vm3 = vmmov %vm5806_vm15 }
 0x5a7   : > { %v2944_v22 = vadd.f32 %v2943_v5, %v2942_v43  ;;  %v3056_v10 = vsel %vm5807_vm12, %v5489_v52, %v5474_v49  ;;  %v2949_v14 = vadd.f32 %v2948_v47, %v2947_v28  ;;  %v2879_v8 = vadd.f32 %v2878_v18, %v2877_v27 }
 0x5a8   : > { %v2939_v36 = vadd.f32 %v2938_v57, %v2937_v23  ;;  %v2957_v0 = vrot.slane %v2956_v34, 2  ;;  %v2874_v50 = vadd.f32 %v2873_v16, %v2872_v19  ;;  %v2887_v30 = vrot.slane %v2886_v13, 1 }
 0x5a9   : > { %vm5808_vm7 = vcmask 1044484   ;;  %v2945_v12 = vrot.slane %v2944_v22, 1  ;;  %v2880_v37 = vrot.slane %v2879_v8, 1  ;;  %v2950_v1 = vrot.slane %v2949_v14, 2 }
 0x5aa   : > { %v2972_v26 = vsel %vm5808_vm7, %v2867_v39, %v2971_v32  ;;  %v2958_v61 = vadd.f32 %v2957_v0, %v2956_v34  ;;  %v3057_v31 = vsel %vm5809_vm8, %v2925_v29, %v3056_v10  ;;  %vm5810_vm0 = vcmask 1045509   ;;  %vm5813_vm10 = vmmov %vm5808_vm7 }
 0x5ab   : > { %v2973_v24 = vsel %vm5810_vm0, %v2874_v50, %v2972_v26  ;;  %v2946_v46 = vadd.f32 %v2945_v12, %v2944_v22  ;;  %v3058_v7 = vsel %vm5811_vm3, %v2932_v15, %v3057_v31  ;;  %v2881_v49 = vadd.f32 %v2880_v37, %v2879_v8  ;;  %vm5815_vm1 = vmmov %vm5810_vm0 }
 0x5ac   : > { %v2951_v52 = vadd.f32 %v2950_v1, %v2949_v14  ;;  %v2888_v58 = vadd.f32 %v2887_v30, %v2886_v13  ;;  %v2959_v23 = vrot.slane %v2958_v61, 1  ;;  %vm5812_vm9 = vcmask 1046534  }
 0x5ad   : > { %v2974_v42 = vsel %vm5812_vm9, %v2881_v49, %v2973_v24  ;;  %v3059_v55 = vsel %vm5813_vm10, %v2939_v36, %v3058_v7  ;;  %vm5814_vm11 = vcmask 1047559   ;;  %vm5816_vm13 = vmmov %vm5812_vm9 }
 0x5ae   : > { %v2952_v53 = vrot.slane %v2951_v52, 1  ;;  %v2975_v6 = vsel %vm5814_vm11, %v2888_v58, %v2974_v42  ;;  %v3060_v9 = vsel %vm5815_vm1, %v2946_v46, %v3059_v55  ;;  %v2960_v21 = vadd.f32 %v2959_v23, %v2958_v61  ;;  %vm5817_vm4 = vmmov %vm5814_vm11 }
 0x5af   : > { %4166 = vmatmul.mubr.f32.vlgmr.msra.gmra.mrb[50].mxu1 %v2975_v6 }
 0x5b0   : > { %v2953_v29 = vadd.f32 %v2952_v53, %v2951_v52 }
 0x5b2   : > { %v3061_v63 = vsel %vm5816_vm13, %v2953_v29, %v3060_v9 }
 0x5b3   : > { %v3062_v17 = vsel %vm5817_vm4, %v2960_v21, %v3061_v63 }
 0x5b4   : > { %4201 = vmatmul.mubr.f32.vlgmr.msra.gmra.mrb[34].mxu0 %v3062_v17 }
 0x682   : > { %v3043_v43 = vpop.f32.mrb[50].mxu1 }
 0x683   : > { %v3047_v35 = vmul.f32 0.00390625, %v3043_v43  ;;  %v4167_v39 = vpop.f32.mrb[51].mxu1 }
 0x685   : > { %v3135_v27 = vmul.f32 %v3047_v35, %v3047_v35  ;;  %v3141_v13 = vcombine.high %v3047_v35, %v3047_v35  ;;  %v3148_v4 = vrot.slane %v3047_v35, %v5115_v59 }
 0x687   : > { %v3130_v57 = vpop.f32.mrb[34].mxu0  ;;  %v3155_v18 = vrot.slane %v3141_v13, %v5115_v59  ;;  %v3156_v47 = vcombine.high %v3148_v4, %v3148_v4  ;;  %v3164_v16 = vrot.slane %v3148_v4, %v5115_v59 }
 0x688   : > { %v3134_v28 = vmul.f32 0.00390625, %v3130_v57  ;;  %v4202_v19 = vpop.f32.mrb[35].mxu0 }
 0x689   : > { %v3157_v15 = vcombine.high %v3155_v18, %v3155_v18  ;;  %v3178_v22 = vrot.slane %v3156_v47, %v5115_v59  ;;  %v3171_v10 = vrot.slane %v3155_v18, %v5115_v59  ;;  %v3186_v14 = vcombine.high %v3164_v16, %v3164_v16 }
 0x68a   : > { %v3136_v5 = vsub.f32 %v3134_v28, %v3135_v27  ;;  %v3193_v0 = vrot.slane %v3164_v16, %v5122_v51 }
 0x68b   : > { %v3185_v8 = vrot.slane %v3157_v15, %v5115_v59  ;;  %v3188_v36 = vcombine.high %v3178_v22, %v3178_v22  ;;  %v3187_v50 = vcombine.high %v3171_v10, %v3171_v10  ;;  %v3197_v30 = vrot.slane %v3178_v22, %v5122_v51 }
 0x68c   : > { %v3137_v32 = vmax.f32 %v3136_v5, 0.0  ;;  %v3201_v26 = vrot.slane %v3186_v14, %v5122_v51  ;;  %v3209_v1 = vrot.slane %v3171_v10, %v5122_v51  ;;  %v3230_v61 = vsub.f32 %v5389_v3, %v3193_v0 }
 0x68d   : > { %v3189_v12 = vcombine.high %v3185_v8, %v3185_v8  ;;  %v3205_v37 = vrot.slane %v3188_v36, %v5122_v51  ;;  %v3213_v24 = vrot.slane %v3185_v8, %v5122_v51  ;;  %v3217_v46 = vrot.slane %v3187_v50, %v5122_v51 }
 0x68e   : > { %v3138_v34 = vadd.f32 1e-05, %v3137_v32  ;;  %v3231_v7 = vsub.f32 %v5392_v62, %v3193_v0  ;;  %v3232_v49 = vsub.f32 %v5379_v2, %v3197_v30  ;;  %v3233_v52 = vsub.f32 %v5407_v60, %v3197_v30 }
 0x68f   : > { %v3234_v58 = vsub.f32 %v5425_v40, %v3201_v26  ;;  %v3221_v53 = vrot.slane %v3189_v12, %v5122_v51  ;;  %v3235_v3 = vsub.f32 %v5430_v38, %v3201_v26  ;;  %v3236_v55 = vsub.f32 %v5410_v56, %v3205_v37 }
 0x690   : > { %4372 = vrsqrt.f32 %v3138_v34  ;;  %v3237_v6 = vsub.f32 %v5451_v41, %v3205_v37  ;;  %v3238_v9 = vsub.f32 %v5472_v11, %v3209_v1  ;;  %v3239_v40 = vsub.f32 %v5477_v44, %v3209_v1 }
 0x691   : > { %v3240_v29 = vsub.f32 %v5448_v48, %v3213_v24  ;;  %v3241_v21 = vsub.f32 %v5509_v20, %v3213_v24  ;;  %v3242_v63 = vsub.f32 %v5531_v33, %v3217_v46  ;;  %v3243_v11 = vsub.f32 %v5534_v25, %v3217_v46 }
 0x692   : > { %v3244_v43 = vsub.f32 %v5506_v54, %v3221_v53  ;;  %v3245_v35 = vsub.f32 %v5512_v45, %v3221_v53 }
 0x69a   : > { %v4373_v31 = vpop.eup %4372 }
 0x69b   : > { %v3247_v23 = vcombine.high %v4373_v31, %v4373_v31  ;;  %v3254_v42 = vrot.slane %v4373_v31, %v5115_v59 }
 0x69d   : > { %v3261_v62 = vrot.slane %v3247_v23, %v5115_v59  ;;  %v3262_v2 = vcombine.high %v3254_v42, %v3254_v42  ;;  %v3270_v60 = vrot.slane %v3254_v42, %v5115_v59 }
 0x69f   : > { %v3263_v38 = vcombine.high %v3261_v62, %v3261_v62  ;;  %v3277_v56 = vrot.slane %v3261_v62, %v5115_v59  ;;  %v3284_v41 = vrot.slane %v3262_v2, %v5115_v59  ;;  %v3292_v17 = vcombine.high %v3270_v60, %v3270_v60 }
 0x6a0   : > { %v3299_v44 = vrot.slane %v3270_v60, %v5122_v51 }
 0x6a1   : > { %v3291_v48 = vrot.slane %v3263_v38, %v5115_v59  ;;  %v3293_v39 = vcombine.high %v3277_v56, %v3277_v56  ;;  %v3294_v20 = vcombine.high %v3284_v41, %v3284_v41  ;;  %v3303_v33 = vrot.slane %v3284_v41, %v5122_v51 }
 0x6a2   : > { %v3307_v57 = vrot.slane %v3292_v17, %v5122_v51  ;;  %v3315_v27 = vrot.slane %v3277_v56, %v5122_v51  ;;  %v3336_v28 = vmul.f32 %v3299_v44, %v3230_v61  ;;  %v3337_v19 = vmul.f32 %v3299_v44, %v3231_v7 }
 0x6a3   : > { %v3295_v5 = vcombine.high %v3291_v48, %v3291_v48  ;;  %v3311_v25 = vrot.slane %v3294_v20, %v5122_v51  ;;  %v3319_v54 = vrot.slane %v3291_v48, %v5122_v51  ;;  %v3323_v45 = vrot.slane %v3293_v39, %v5122_v51 }
 0x6a4   : > { %v3338_v13 = vmul.f32 %v3303_v33, %v3232_v49  ;;  %v3339_v4 = vmul.f32 %v3303_v33, %v3233_v52  ;;  %v3340_v59 = vmul.f32 %v3307_v57, %v3234_v58  ;;  %v3341_v18 = vmul.f32 %v3307_v57, %v3235_v3 }
 0x6a5   : > { %v3327_v47 = vrot.slane %v3295_v5, %v5122_v51  ;;  %v3342_v32 = vmul.f32 %v3311_v25, %v3236_v55  ;;  %v3343_v34 = vmul.f32 %v3311_v25, %v3237_v6  ;;  %v3344_v16 = vmul.f32 %v3315_v27, %v3238_v9 }
 0x6a6   : > { %v3345_v15 = vmul.f32 %v3315_v27, %v3239_v40  ;;  %v3346_v22 = vmul.f32 %v3319_v54, %v3240_v29  ;;  %v3347_v10 = vmul.f32 %v3319_v54, %v3241_v21  ;;  %v3348_v14 = vmul.f32 %v3323_v45, %v3242_v63 }
 0x6a7   : > { %v3349_v8 = vmul.f32 %v3323_v45, %v3243_v11  ;;  %v3350_v36 = vmul.f32 %v3327_v47, %v3244_v43  ;;  %v3351_v0 = vmul.f32 %v3327_v47, %v3245_v35  ;;  %vm3352_vm2 = vcmp.ge.f32.partialorder %v3336_v28, 0.0 }
 0x6a8   : > { %vm3353_vm14 = vcmp.ge.f32.partialorder %v3337_v19, 0.0  ;;  %vm3354_vm5 = vcmp.ge.f32.partialorder %v3338_v13, 0.0  ;;  %vm3355_vm6 = vcmp.ge.f32.partialorder %v3339_v4, 0.0  ;;  %vm3356_vm15 = vcmp.ge.f32.partialorder %v3340_v59, 0.0 }
 0x6a9   : > { %vm3357_vm12 = vcmp.ge.f32.partialorder %v3341_v18, 0.0  ;;  %vm3358_vm7 = vcmp.ge.f32.partialorder %v3342_v32, 0.0  ;;  %vm3359_vm8 = vcmp.ge.f32.partialorder %v3343_v34, 0.0  ;;  %vm3360_vm0 = vcmp.ge.f32.partialorder %v3344_v16, 0.0 }
 0x6aa   : > { %vm3361_vm3 = vcmp.ge.f32.partialorder %v3345_v15, 0.0  ;;  %vm3362_vm9 = vcmp.ge.f32.partialorder %v3346_v22, 0.0  ;;  %vm3363_vm10 = vcmp.ge.f32.partialorder %v3347_v10, 0.0  ;;  %vm3364_vm11 = vcmp.ge.f32.partialorder %v3348_v14, 0.0 }
 0x6ab   : > { %vm3365_vm1 = vcmp.ge.f32.partialorder %v3349_v8, 0.0  ;;  %vm3366_vm13 = vcmp.ge.f32.partialorder %v3350_v36, 0.0  ;;  %vm3367_vm4 = vcmp.ge.f32.partialorder %v3351_v0, 0.0  ;;  %v3368_v51 = vmul.f32 0.2, %v3336_v28 }
 0x6ac   : > { %v3369_v50 = vmul.f32 0.2, %v3337_v19  ;;  %v3370_v30 = vmul.f32 0.2, %v3338_v13  ;;  %v3371_v26 = vmul.f32 0.2, %v3339_v4 }
 0x6ad   : > { %v3372_v12 = vmul.f32 0.2, %v3340_v59  ;;  %v3373_v37 = vmul.f32 0.2, %v3341_v18  ;;  %v3374_v1 = vmul.f32 0.2, %v3342_v32  ;;  %v3384_v61 = vsel %vm3352_vm2, %v3336_v28, %v3368_v51 }
 0x6ae   : > { %v3375_v31 = vmul.f32 0.2, %v3343_v34  ;;  %v3376_v24 = vmul.f32 0.2, %v3344_v16  ;;  %v3377_v46 = vmul.f32 0.2, %v3345_v15  ;;  %v3385_v7 = vsel %vm3353_vm14, %v3337_v19, %v3369_v50  ;;  %3400 = vst [vmem:[%s5608_s20] sm:$0xff] %v3384_v61 }
 0x6af   : > { %v3378_v49 = vmul.f32 0.2, %v3346_v22  ;;  %v3379_v52 = vmul.f32 0.2, %v3347_v10  ;;  %v3380_v58 = vmul.f32 0.2, %v3348_v14  ;;  %v3386_v23 = vsel %vm3354_vm5, %v3338_v13, %v3370_v30 }
 0x6b0   : > { %3401 = vst [vmem:[%s5608_s20 + $0x8] sm:$0xff] %v3385_v7  ;;  %v3381_v42 = vmul.f32 0.2, %v3349_v8  ;;  %v3382_v53 = vmul.f32 0.2, %v3350_v36  ;;  %v3387_v55 = vsel %vm3355_vm6, %v3339_v4, %v3371_v26  ;;  %3402 = vst [vmem:[%s5608_s20 + $0x10] sm:$0xff] %v3386_v23  ;;  %v3388_v6 = vsel %vm3356_vm15, %v3340_v59, %v3372_v12 }
 0x6b1   : > { %v3383_v3 = vmul.f32 0.2, %v3351_v0  ;;  %v3389_v9 = vsel %vm3357_vm12, %v3341_v18, %v3373_v37  ;;  %v3390_v62 = vsel %vm3358_vm7, %v3342_v32, %v3374_v1  ;;  %v3391_v2 = vsel %vm3359_vm8, %v3343_v34, %v3375_v31  ;;  %3403 = vst [vmem:[%s5608_s20 + $0x18] sm:$0xff] %v3387_v55  ;;  %3404 = vst [vmem:[%s5608_s20 + $0x20] sm:$0xff] %v3388_v6 }
 0x6b2   : > { %v3392_v60 = vsel %vm3360_vm0, %v3344_v16, %v3376_v24  ;;  %v3393_v40 = vsel %vm3361_vm3, %v3345_v15, %v3377_v46  ;;  %v3394_v29 = vsel %vm3362_vm9, %v3346_v22, %v3378_v49  ;;  %v3395_v21 = vsel %vm3363_vm10, %v3347_v10, %v3379_v52  ;;  %3405 = vst [vmem:[%s5608_s20 + $0x28] sm:$0xff] %v3389_v9 }
 0x6b3   : > { %3406 = vst [vmem:[%s5608_s20 + $0x30] sm:$0xff] %v3390_v62  ;;  %3407 = vst [vmem:[%s5608_s20 + $0x38] sm:$0xff] %v3391_v2  ;;  %v3396_v63 = vsel %vm3364_vm11, %v3348_v14, %v3380_v58  ;;  %v3397_v38 = vsel %vm3365_vm1, %v3349_v8, %v3381_v42  ;;  %v3398_v56 = vsel %vm3366_vm13, %v3350_v36, %v3382_v53 }
 0x6b4   : > { %v3399_v41 = vsel %vm3367_vm4, %v3351_v0, %v3383_v3  ;;  %3408 = vst [vmem:[%s5608_s20 + $0x40] sm:$0xff] %v3392_v60  ;;  %3409 = vst [vmem:[%s5608_s20 + $0x48] sm:$0xff] %v3393_v40 }
 0x6b5   : > { %3410 = vst [vmem:[%s5608_s20 + $0x50] sm:$0xff] %v3394_v29  ;;  %3411 = vst [vmem:[%s5608_s20 + $0x58] sm:$0xff] %v3395_v21 }
 0x6b6   : > { %3412 = vst [vmem:[%s5608_s20 + $0x60] sm:$0xff] %v3396_v63  ;;  %3413 = vst [vmem:[%s5608_s20 + $0x68] sm:$0xff] %v3397_v38 }
 0x6b7   : > { %3414 = vst [vmem:[%s5608_s20 + $0x70] sm:$0xff] %v3398_v56  ;;  %3415 = vst [vmem:[%s5608_s20 + $0x78] sm:$0xff] %v3399_v41 }
 0x6b8 PF: > { %s17_s24 = sadd.s32 1, %s4380_s24  }
 0x6b9   : > { %p14_p4 = scmp.ge.s32.totalorder %s17_s24, 4  }
 0x6bb   :  { %16 = sbr.rel (!%p14_p4) target bundleno = 1 (0x1), region = 85 }

</bundles_post_ra>
